<compile_context>
chip_gen: v7x
topology: tpu7x:2x2x1
jax: 0.10.0
libtpu: 0.0.40
codegen_flags: <defaults>
</compile_context>

<pallas_src>
import math

import jax
import jax.numpy as jnp
from jax.experimental import pallas as pl
from jax.experimental.pallas import tpu as pltpu

# ---- small synthetic CTRL hyper-parameters -----------------------------------
VOCAB = 64
D_MODEL = 32
NUM_HEADS = 4
DEPTH = D_MODEL // NUM_HEADS
DFF = 64
NUM_LAYERS = 2
LN_EPS = 1e-6
PACK_W = 3 * D_MODEL            # packed small-param row width (>= max(3D, DFF, D))


# ---- in-kernel helpers --------------------------------------------------------
def _layernorm(x, g, b):
    mu = jnp.mean(x, axis=-1, keepdims=True)
    var = jnp.mean((x - mu) ** 2, axis=-1, keepdims=True)
    return (x - mu) * jax.lax.rsqrt(var + LN_EPS) * g + b


# ---- fused forward: embedding + all encoder layers + head in one pallas_call ---
def _make_fused_forward(B, S):
    def kernel(ids_ref, pos_ref,
               wqkv_ref, wo_ref, w1_ref, w2_ref,
               small_ref, lnf_ref, we_ref, be_ref,
               logits_ref, kv_ref,
               x_sc):
        layer = pl.program_id(1)

        # -- step 0 (per batch element): tied-embedding lookup, scale, pos-enc --
        @pl.when(layer == 0)
        def _():
            ids = ids_ref[0]                                        # (S, 1) int32
            voc = jax.lax.broadcasted_iota(jnp.int32, (S, VOCAB), 1)
            onehot = (voc == ids).astype(jnp.float32)               # (S, V)
            emb = jnp.dot(onehot, we_ref[...],
                          preferred_element_type=jnp.float32)       # (S, D)
            x_sc[...] = emb * math.sqrt(D_MODEL) + pos_ref[...]

        x = x_sc[...]                                               # (S, D) resident

        # -- unpack the per-layer small-parameter slab (one DMA, 8 tensors) -----
        pk = small_ref[0]                                           # (8, PACK_W)
        bqkv = pk[0:1, :3 * D_MODEL]
        bo = pk[1:2, :D_MODEL]
        b1 = pk[2:3, :DFF]
        b2 = pk[3:4, :D_MODEL]
        ln1g = pk[4:5, :D_MODEL]
        ln1b = pk[5:6, :D_MODEL]
        ln2g = pk[6:7, :D_MODEL]
        ln2b = pk[7:8, :D_MODEL]

        # -- self-attention block (pre-LN), fused QKV projection ----------------
        xn = _layernorm(x, ln1g, ln1b)
        qkv = jnp.dot(xn, wqkv_ref[0],
                      preferred_element_type=jnp.float32) + bqkv    # (S, 3D)
        q = qkv[:, :D_MODEL]
        k = qkv[:, D_MODEL:2 * D_MODEL]
        v = qkv[:, 2 * D_MODEL:]
        # packed "present" KV: one lane-denser writeback per step.
        kv_ref[0, 0] = jnp.concatenate([k, v], axis=-1)             # (S, 2D)

        # causal additive bias (-1e4, CTRL parity), built once per step, shared
        # across heads.  No cross-batch term needed: this grid step IS one batch.
        row = jax.lax.broadcasted_iota(jnp.int32, (S, S), 0)
        col = jax.lax.broadcasted_iota(jnp.int32, (S, S), 1)
        causal_bias = jnp.where(col > row, jnp.float32(-1e4), jnp.float32(0.0))

        scale = 1.0 / math.sqrt(DEPTH)
        heads = []
        # Static Python loop is fine at 4 heads.
        # TODO(synk): switch to lax.fori_loop(unroll=True) / a grid axis at many heads.
        for h in range(NUM_HEADS):
            qh = q[:, h * DEPTH:(h + 1) * DEPTH]                    # (S, depth)
            kh = k[:, h * DEPTH:(h + 1) * DEPTH]
            vh = v[:, h * DEPTH:(h + 1) * DEPTH]
            s = jax.lax.dot_general(qh, kh, (((1,), (1,)), ((), ())),
                                    preferred_element_type=jnp.float32) * scale
            s = s + causal_bias                                     # (S, S)
            m = jnp.max(s, axis=-1, keepdims=True)
            e = jnp.exp(s - m)
            p = e * pl.reciprocal(jnp.sum(e, axis=-1, keepdims=True), approx=True)
            heads.append(jnp.dot(p, vh, preferred_element_type=jnp.float32))
        ctx = jnp.concatenate(heads, axis=-1)                       # (S, D)

        attn_out = jnp.dot(ctx, wo_ref[0],
                           preferred_element_type=jnp.float32) + bo
        out1 = x + attn_out                                         # residual 1

        # -- FFN block (pre-LN) --------------------------------------------------
        xn2 = _layernorm(out1, ln2g, ln2b)
        h1 = jnp.maximum(
            jnp.dot(xn2, w1_ref[0], preferred_element_type=jnp.float32) + b1, 0.0)
        ffn = jnp.dot(h1, w2_ref[0],
                      preferred_element_type=jnp.float32) + b2
        x_new = out1 + ffn                                          # residual 2
        x_sc[...] = x_new

        # -- last layer: final LayerNorm + tied-softmax (x @ W_embed.T + b) ------
        @pl.when(layer == pl.num_programs(1) - 1)
        def _():
            xf = _layernorm(x_new, lnf_ref[0:1, :], lnf_ref[1:2, :])
            logits_ref[0] = jax.lax.dot_general(
                xf, we_ref[...], (((1,), (1,)), ((), ())),          # trans_b: no W.T copy
                preferred_element_type=jnp.float32) + be_ref[...]

    per_layer3 = lambda shape: pl.BlockSpec((1,) + shape, lambda b, l: (l, 0, 0))
    const2 = lambda shape: pl.BlockSpec(shape, lambda b, l: (0, 0))

    in_specs = [
        pl.BlockSpec((1, S, 1), lambda b, l: (b, 0, 0)),            # token ids (int32)
        const2((S, D_MODEL)),                                       # positional encoding
        per_layer3((D_MODEL, 3 * D_MODEL)),                         # Wqkv (fused)
        per_layer3((D_MODEL, D_MODEL)),                             # Wo
        per_layer3((D_MODEL, DFF)),                                 # W1
        per_layer3((DFF, D_MODEL)),                                 # W2
        per_layer3((8, PACK_W)),                                    # packed small params
        const2((2, D_MODEL)),                                       # final LN gamma/beta
        const2((VOCAB, D_MODEL)),                                   # tied embedding weight
        const2((1, VOCAB)),                                         # tied softmax bias
    ]
    out_specs = (
        pl.BlockSpec((1, S, VOCAB), lambda b, l: (b, 0, 0)),                # logits
        pl.BlockSpec((1, 1, S, 2 * D_MODEL), lambda b, l: (l, b, 0, 0)),    # packed K|V
    )
    out_shape = (
        jax.ShapeDtypeStruct((B, S, VOCAB), jnp.float32),
        jax.ShapeDtypeStruct((NUM_LAYERS, B, S, 2 * D_MODEL), jnp.float32),
    )

    return pl.pallas_call(
        kernel,
        out_shape=out_shape,
        grid=(B, NUM_LAYERS),
        in_specs=in_specs,
        out_specs=out_specs,
        scratch_shapes=[pltpu.VMEM((S, D_MODEL), jnp.float32)],     # resident activation
        compiler_params=pltpu.CompilerParams(
            dimension_semantics=("parallel", "arbitrary"),
            vmem_limit_bytes=32 * 1024 * 1024,
        ),
    )


# ---- parameter construction (deterministic, synthetic) -------------------------
def positional_encoding(position, d_model):
    pos = jnp.arange(position, dtype=jnp.float32)[:, None]
    i = jnp.arange(d_model, dtype=jnp.float32)[None, :]
    angle_rates = 1.0 / jnp.power(10000.0, (2.0 * jnp.floor(i / 2.0)) / d_model)
    angle_rads = pos * angle_rates
    sines = jnp.sin(angle_rads[:, 0::2])
    cosines = jnp.cos(angle_rads[:, 1::2])
    return jnp.concatenate([sines, cosines], axis=-1)


def init_params(key):
    keys = iter(jax.random.split(key, 8))
    nrm = lambda shape, s: s * jax.random.normal(next(keys), shape, jnp.float32)
    # packed per-layer small params: rows = [bqkv, bo, b1, b2, ln1_g, ln1_b, ln2_g, ln2_b]
    small = jnp.zeros((NUM_LAYERS, 8, PACK_W), jnp.float32)
    small = small.at[:, 4, :D_MODEL].set(1.0)   # ln1 gamma
    small = small.at[:, 6, :D_MODEL].set(1.0)   # ln2 gamma
    ln_f = jnp.concatenate([jnp.ones((1, D_MODEL), jnp.float32),
                            jnp.zeros((1, D_MODEL), jnp.float32)], axis=0)
    return {
        "embed_w": nrm((VOCAB, D_MODEL), 0.01),
        "embed_b": jnp.zeros((1, VOCAB), jnp.float32),
        "ln_f": ln_f,
        "pos_encoding": positional_encoding(64, D_MODEL),
        # per-layer weights stacked on a leading (NUM_LAYERS, ...) axis so one
        # fused pallas_call can index them with the layer grid axis.
        "wqkv": nrm((NUM_LAYERS, D_MODEL, 3 * D_MODEL), 0.02),   # [Wq | Wk | Wv]
        "wo": nrm((NUM_LAYERS, D_MODEL, D_MODEL), 0.02),
        "w1": nrm((NUM_LAYERS, D_MODEL, DFF), 0.02),
        "w2": nrm((NUM_LAYERS, DFF, D_MODEL), 0.02),
        "small": small,
    }


# ---- full CTRLmodel.forward -----------------------------------------------------
def ctrl_forward(params, inputs):
    B, S = inputs.shape
    ids = inputs.reshape(B, S, 1).astype(jnp.int32)
    pos = params["pos_encoding"][:S]                              # (S, D)

    fused = _make_fused_forward(B, S)
    logits, kv_all = fused(
        ids, pos,
        params["wqkv"], params["wo"], params["w1"], params["w2"],
        params["small"], params["ln_f"], params["embed_w"], params["embed_b"])

    # presents: split packed K|V and head-split once, post-kernel, in XLA.
    k_all = kv_all[..., :D_MODEL]                                 # (L, B, S, D)
    v_all = kv_all[..., D_MODEL:]
    kh = k_all.reshape(NUM_LAYERS, B, S, NUM_HEADS, DEPTH).transpose(0, 1, 3, 2, 4)
    vh = v_all.reshape(NUM_LAYERS, B, S, NUM_HEADS, DEPTH).transpose(0, 1, 3, 2, 4)
    presents_all = jnp.stack([kh, vh], axis=1)                    # (L, 2, B, H, S, depth)
    presents = [presents_all[l] for l in range(NUM_LAYERS)]
    return logits, presents


if __name__ == "__main__":
    key = jax.random.PRNGKey(0)
    pkey, ikey = jax.random.split(key)
    params = init_params(pkey)

    B, S = 2, 8
    token_ids = jax.random.randint(ikey, (B, S), 0, VOCAB, dtype=jnp.int32)

    fwd = jax.jit(ctrl_forward)
    logits, presents = fwd(params, token_ids)
    jax.block_until_ready(logits)
    jax.block_until_ready(presents)

    assert logits.shape == (B, S, VOCAB)
    assert len(presents) == NUM_LAYERS
    assert presents[0].shape == (2, B, NUM_HEADS, S, DEPTH)
    assert bool(jnp.all(jnp.isfinite(logits)))
    print("KERNEL_OK")
</pallas_src>

<mosaic_0001>
module attributes {stable_mosaic.version = 11 : i64} {
  func.func @kernel(%arg0: i32, %arg1: i32, %arg2: memref<1x8x1xi32, #tpu.memory_space<vmem>>, %arg3: memref<8x32xf32, #tpu.memory_space<vmem>>, %arg4: memref<1x32x96xf32, #tpu.memory_space<vmem>>, %arg5: memref<1x32x32xf32, #tpu.memory_space<vmem>>, %arg6: memref<1x32x64xf32, #tpu.memory_space<vmem>>, %arg7: memref<1x64x32xf32, #tpu.memory_space<vmem>>, %arg8: memref<1x8x96xf32, #tpu.memory_space<vmem>>, %arg9: memref<2x32xf32, #tpu.memory_space<vmem>>, %arg10: memref<64x32xf32, #tpu.memory_space<vmem>>, %arg11: memref<1x64xf32, #tpu.memory_space<vmem>>, %arg12: memref<1x8x64xf32, #tpu.memory_space<vmem>>, %arg13: memref<1x1x8x64xf32, #tpu.memory_space<vmem>>, %arg14: memref<8x32xf32, #tpu.memory_space<vmem>>) attributes {dimension_semantics = [#tpu.dimension_semantics<parallel>, #tpu.dimension_semantics<arbitrary>], iteration_bounds = array<i64: 2, 2>, scalar_prefetch = 0 : i64, scratch_operands = 1 : i64, tpu.core_type = #tpu.core_type<tc>, window_params = [{transform_indices = @transform_0, window_bounds = array<i64: 1, 8, 1>}, {pipeline_mode = #tpu.pipeline_mode<synchronous>, transform_indices = @transform_1, window_bounds = array<i64: 8, 32>}, {transform_indices = @transform_2, window_bounds = array<i64: 1, 32, 96>}, {transform_indices = @transform_3, window_bounds = array<i64: 1, 32, 32>}, {transform_indices = @transform_4, window_bounds = array<i64: 1, 32, 64>}, {transform_indices = @transform_5, window_bounds = array<i64: 1, 64, 32>}, {transform_indices = @transform_6, window_bounds = array<i64: 1, 8, 96>}, {pipeline_mode = #tpu.pipeline_mode<synchronous>, transform_indices = @transform_7, window_bounds = array<i64: 2, 32>}, {pipeline_mode = #tpu.pipeline_mode<synchronous>, transform_indices = @transform_8, window_bounds = array<i64: 64, 32>}, {pipeline_mode = #tpu.pipeline_mode<synchronous>, transform_indices = @transform_9, window_bounds = array<i64: 1, 64>}, {transform_indices = @transform_10, window_bounds = array<i64: 1, 8, 64>}, {transform_indices = @transform_11, window_bounds = array<i64: 1, 1, 8, 64>}]} {
    %c0_i32 = arith.constant 0 : i32
    %0 = arith.cmpi eq, %arg1, %c0_i32 : i32
    %1 = arith.extui %0 : i1 to i32
    %c0_i32_0 = arith.constant 0 : i32
    %2 = arith.cmpi ne, %1, %c0_i32_0 : i32
    scf.if %2 {
      %c0_60 = arith.constant 0 : index
      %c0_61 = arith.constant 0 : index
      %c0_62 = arith.constant 0 : index
      %172 = vector.load %arg2[%c0_60, %c0_61, %c0_62] : memref<1x8x1xi32, #tpu.memory_space<vmem>>, vector<1x8x1xi32>
      %173 = vector.shape_cast %172 : vector<1x8x1xi32> to vector<8x1xi32>
      %174 = tpu.iota {dimensions = array<i32: 1>} : vector<8x64xi32>
      %175 = vector.broadcast %173 : vector<8x1xi32> to vector<8x64xi32>
      %176 = arith.cmpi eq, %174, %175 : vector<8x64xi32>
      %177 = arith.extui %176 : vector<8x64xi1> to vector<8x64xi32>
      %178 = arith.sitofp %177 : vector<8x64xi32> to vector<8x64xf32>
      %c0_63 = arith.constant 0 : index
      %c0_64 = arith.constant 0 : index
      %179 = vector.load %arg10[%c0_63, %c0_64] : memref<64x32xf32, #tpu.memory_space<vmem>>, vector<64x32xf32>
      %cst_65 = arith.constant dense<0.000000e+00> : vector<8x32xf32>
      %180 = tpu.matmul %178, %179, %cst_65 {dimension_numbers = #tpu.dot_dimension_numbers<[1], [0], [0], [1], [0, 0, 1, 1], [], []>} : vector<8x64xf32>, vector<64x32xf32>, vector<8x32xf32> -> vector<8x32xf32>
      %cst_66 = arith.constant 5.65685415 : f32
      %181 = vector.broadcast %cst_66 : f32 to vector<8x32xf32>
      %182 = arith.mulf %180, %181 : vector<8x32xf32>
      %c0_67 = arith.constant 0 : index
      %c0_68 = arith.constant 0 : index
      %183 = vector.load %arg3[%c0_67, %c0_68] : memref<8x32xf32, #tpu.memory_space<vmem>>, vector<8x32xf32>
      %184 = arith.addf %182, %183 : vector<8x32xf32>
      %c0_69 = arith.constant 0 : index
      %c0_70 = arith.constant 0 : index
      %185 = vector.load %arg14[%c0_69, %c0_70] : memref<8x32xf32, #tpu.memory_space<vmem>>, vector<8x32xf32>
      tpu.vector_store %arg14[%c0_69, %c0_70], %184 {strides = array<i32>} : memref<8x32xf32, #tpu.memory_space<vmem>>, vector<8x32xf32>,
    } else {
    }
    %c0 = arith.constant 0 : index
    %c0_1 = arith.constant 0 : index
    %3 = vector.load %arg14[%c0, %c0_1] : memref<8x32xf32, #tpu.memory_space<vmem>>, vector<8x32xf32>
    %c0_2 = arith.constant 0 : index
    %c0_3 = arith.constant 0 : index
    %c0_4 = arith.constant 0 : index
    %4 = vector.load %arg8[%c0_2, %c0_3, %c0_4] : memref<1x8x96xf32, #tpu.memory_space<vmem>>, vector<1x8x96xf32>
    %5 = vector.shape_cast %4 : vector<1x8x96xf32> to vector<8x96xf32>
    %6 = vector.extract_strided_slice %5 {offsets = [0, 0], sizes = [1, 96], strides = [1, 1]} : vector<8x96xf32> to vector<1x96xf32>
    %7 = vector.extract_strided_slice %5 {offsets = [1, 0], sizes = [1, 32], strides = [1, 1]} : vector<8x96xf32> to vector<1x32xf32>
    %8 = vector.extract_strided_slice %5 {offsets = [2, 0], sizes = [1, 64], strides = [1, 1]} : vector<8x96xf32> to vector<1x64xf32>
    %9 = vector.extract_strided_slice %5 {offsets = [3, 0], sizes = [1, 32], strides = [1, 1]} : vector<8x96xf32> to vector<1x32xf32>
    %10 = vector.extract_strided_slice %5 {offsets = [4, 0], sizes = [1, 32], strides = [1, 1]} : vector<8x96xf32> to vector<1x32xf32>
    %11 = vector.extract_strided_slice %5 {offsets = [5, 0], sizes = [1, 32], strides = [1, 1]} : vector<8x96xf32> to vector<1x32xf32>
    %12 = vector.extract_strided_slice %5 {offsets = [6, 0], sizes = [1, 32], strides = [1, 1]} : vector<8x96xf32> to vector<1x32xf32>
    %13 = vector.extract_strided_slice %5 {offsets = [7, 0], sizes = [1, 32], strides = [1, 1]} : vector<8x96xf32> to vector<1x32xf32>
    %cst = arith.constant dense<0.000000e+00> : vector<8xf32>
    %14 = vector.multi_reduction <add>, %3, %cst [1] : vector<8x32xf32> to vector<8xf32>
    %15 = vector.shape_cast %14 : vector<8xf32> to vector<8x1xf32>
    %cst_5 = arith.constant 3.200000e+01 : f32
    %16 = vector.broadcast %cst_5 : f32 to vector<8x1xf32>
    %17 = arith.divf %15, %16 : vector<8x1xf32>
    %18 = vector.broadcast %17 : vector<8x1xf32> to vector<8x32xf32>
    %19 = arith.subf %3, %18 : vector<8x32xf32>
    %20 = arith.mulf %19, %19 : vector<8x32xf32>
    %cst_6 = arith.constant dense<0.000000e+00> : vector<8xf32>
    %21 = vector.multi_reduction <add>, %20, %cst_6 [1] : vector<8x32xf32> to vector<8xf32>
    %22 = vector.shape_cast %21 : vector<8xf32> to vector<8x1xf32>
    %cst_7 = arith.constant 3.200000e+01 : f32
    %23 = vector.broadcast %cst_7 : f32 to vector<8x1xf32>
    %24 = arith.divf %22, %23 : vector<8x1xf32>
    %25 = vector.broadcast %17 : vector<8x1xf32> to vector<8x32xf32>
    %26 = arith.subf %3, %25 : vector<8x32xf32>
    %cst_8 = arith.constant 9.99999997E-7 : f32
    %27 = vector.broadcast %cst_8 : f32 to vector<8x1xf32>
    %28 = arith.addf %24, %27 : vector<8x1xf32>
    %29 = math.rsqrt %28 : vector<8x1xf32>
    %30 = vector.broadcast %29 : vector<8x1xf32> to vector<8x32xf32>
    %31 = arith.mulf %26, %30 : vector<8x32xf32>
    %32 = vector.broadcast %10 : vector<1x32xf32> to vector<8x32xf32>
    %33 = arith.mulf %31, %32 : vector<8x32xf32>
    %34 = vector.broadcast %11 : vector<1x32xf32> to vector<8x32xf32>
    %35 = arith.addf %33, %34 : vector<8x32xf32>
    %c0_9 = arith.constant 0 : index
    %c0_10 = arith.constant 0 : index
    %c0_11 = arith.constant 0 : index
    %36 = vector.load %arg4[%c0_9, %c0_10, %c0_11] : memref<1x32x96xf32, #tpu.memory_space<vmem>>, vector<1x32x96xf32>
    %37 = vector.shape_cast %36 : vector<1x32x96xf32> to vector<32x96xf32>
    %cst_12 = arith.constant dense<0.000000e+00> : vector<8x96xf32>
    %38 = tpu.matmul %35, %37, %cst_12 {dimension_numbers = #tpu.dot_dimension_numbers<[1], [0], [0], [1], [0, 0, 1, 1], [], []>} : vector<8x32xf32>, vector<32x96xf32>, vector<8x96xf32> -> vector<8x96xf32>
    %39 = vector.broadcast %6 : vector<1x96xf32> to vector<8x96xf32>
    %40 = arith.addf %38, %39 : vector<8x96xf32>
    %41 = vector.extract_strided_slice %40 {offsets = [0, 0], sizes = [8, 32], strides = [1, 1]} : vector<8x96xf32> to vector<8x32xf32>
    %42 = vector.extract_strided_slice %40 {offsets = [0, 32], sizes = [8, 32], strides = [1, 1]} : vector<8x96xf32> to vector<8x32xf32>
    %43 = vector.extract_strided_slice %40 {offsets = [0, 64], sizes = [8, 32], strides = [1, 1]} : vector<8x96xf32> to vector<8x32xf32>
    %44 = tpu.concatenate %42, %43 in 1 : vector<8x32xf32>, vector<8x32xf32> -> vector<8x64xf32>
    %c0_13 = arith.constant 0 : index
    %c0_14 = arith.constant 0 : index
    %c0_15 = arith.constant 0 : index
    %c0_16 = arith.constant 0 : index
    %45 = vector.load %arg13[%c0_13, %c0_14, %c0_15, %c0_16] : memref<1x1x8x64xf32, #tpu.memory_space<vmem>>, vector<1x1x8x64xf32>
    %46 = vector.shape_cast %45 : vector<1x1x8x64xf32> to vector<8x64xf32>
    %47 = vector.shape_cast %44 : vector<8x64xf32> to vector<1x1x8x64xf32>
    tpu.vector_store %arg13[%c0_13, %c0_14, %c0_15, %c0_16], %47 {strides = array<i32>} : memref<1x1x8x64xf32, #tpu.memory_space<vmem>>, vector<1x1x8x64xf32>,
    %48 = tpu.iota {dimensions = array<i32: 0>} : vector<8x8xi32>
    %49 = tpu.iota {dimensions = array<i32: 1>} : vector<8x8xi32>
    %50 = arith.cmpi sgt, %49, %48 : vector<8x8xi32>
    %cst_17 = arith.constant -1.000000e+04 : f32
    %cst_18 = arith.constant 0.000000e+00 : f32
    %51 = vector.broadcast %cst_17 : f32 to vector<8x8xf32>
    %52 = vector.broadcast %cst_18 : f32 to vector<8x8xf32>
    %53 = arith.select %50, %51, %52 : vector<8x8xi1>, vector<8x8xf32>
    %54 = vector.extract_strided_slice %41 {offsets = [0, 0], sizes = [8, 8], strides = [1, 1]} : vector<8x32xf32> to vector<8x8xf32>
    %55 = vector.extract_strided_slice %42 {offsets = [0, 0], sizes = [8, 8], strides = [1, 1]} : vector<8x32xf32> to vector<8x8xf32>
    %56 = vector.extract_strided_slice %43 {offsets = [0, 0], sizes = [8, 8], strides = [1, 1]} : vector<8x32xf32> to vector<8x8xf32>
    %cst_19 = arith.constant dense<0.000000e+00> : vector<8x8xf32>
    %57 = tpu.matmul %54, %55, %cst_19 {dimension_numbers = #tpu.dot_dimension_numbers<[1], [1], [0], [0], [0, 0, 1, 0], [], []>} : vector<8x8xf32>, vector<8x8xf32>, vector<8x8xf32> -> vector<8x8xf32>
    %cst_20 = arith.constant 0.353553385 : f32
    %58 = vector.broadcast %cst_20 : f32 to vector<8x8xf32>
    %59 = arith.mulf %57, %58 : vector<8x8xf32>
    %60 = arith.addf %59, %53 : vector<8x8xf32>
    %cst_21 = arith.constant dense<0xFF800000> : vector<8xf32>
    %61 = vector.multi_reduction <maximumf>, %60, %cst_21 [1] : vector<8x8xf32> to vector<8xf32>
    %62 = vector.shape_cast %61 : vector<8xf32> to vector<8x1xf32>
    %63 = vector.broadcast %62 : vector<8x1xf32> to vector<8x8xf32>
    %64 = arith.subf %60, %63 : vector<8x8xf32>
    %65 = math.exp %64 : vector<8x8xf32>
    %cst_22 = arith.constant dense<0.000000e+00> : vector<8xf32>
    %66 = vector.multi_reduction <add>, %65, %cst_22 [1] : vector<8x8xf32> to vector<8xf32>
    %67 = vector.shape_cast %66 : vector<8xf32> to vector<8x1xf32>
    %68 = tpu.reciprocal %67 {approx = true} : vector<8x1xf32> -> vector<8x1xf32>
    %69 = vector.broadcast %68 : vector<8x1xf32> to vector<8x8xf32>
    %70 = arith.mulf %65, %69 : vector<8x8xf32>
    %cst_23 = arith.constant dense<0.000000e+00> : vector<8x8xf32>
    %71 = tpu.matmul %70, %56, %cst_23 {dimension_numbers = #tpu.dot_dimension_numbers<[1], [0], [0], [1], [0, 0, 1, 1], [], []>} : vector<8x8xf32>, vector<8x8xf32>, vector<8x8xf32> -> vector<8x8xf32>
    %72 = vector.extract_strided_slice %41 {offsets = [0, 8], sizes = [8, 8], strides = [1, 1]} : vector<8x32xf32> to vector<8x8xf32>
    %73 = vector.extract_strided_slice %42 {offsets = [0, 8], sizes = [8, 8], strides = [1, 1]} : vector<8x32xf32> to vector<8x8xf32>
    %74 = vector.extract_strided_slice %43 {offsets = [0, 8], sizes = [8, 8], strides = [1, 1]} : vector<8x32xf32> to vector<8x8xf32>
    %cst_24 = arith.constant dense<0.000000e+00> : vector<8x8xf32>
    %75 = tpu.matmul %72, %73, %cst_24 {dimension_numbers = #tpu.dot_dimension_numbers<[1], [1], [0], [0], [0, 0, 1, 0], [], []>} : vector<8x8xf32>, vector<8x8xf32>, vector<8x8xf32> -> vector<8x8xf32>
    %cst_25 = arith.constant 0.353553385 : f32
    %76 = vector.broadcast %cst_25 : f32 to vector<8x8xf32>
    %77 = arith.mulf %75, %76 : vector<8x8xf32>
    %78 = arith.addf %77, %53 : vector<8x8xf32>
    %cst_26 = arith.constant dense<0xFF800000> : vector<8xf32>
    %79 = vector.multi_reduction <maximumf>, %78, %cst_26 [1] : vector<8x8xf32> to vector<8xf32>
    %80 = vector.shape_cast %79 : vector<8xf32> to vector<8x1xf32>
    %81 = vector.broadcast %80 : vector<8x1xf32> to vector<8x8xf32>
    %82 = arith.subf %78, %81 : vector<8x8xf32>
    %83 = math.exp %82 : vector<8x8xf32>
    %cst_27 = arith.constant dense<0.000000e+00> : vector<8xf32>
    %84 = vector.multi_reduction <add>, %83, %cst_27 [1] : vector<8x8xf32> to vector<8xf32>
    %85 = vector.shape_cast %84 : vector<8xf32> to vector<8x1xf32>
    %86 = tpu.reciprocal %85 {approx = true} : vector<8x1xf32> -> vector<8x1xf32>
    %87 = vector.broadcast %86 : vector<8x1xf32> to vector<8x8xf32>
    %88 = arith.mulf %83, %87 : vector<8x8xf32>
    %cst_28 = arith.constant dense<0.000000e+00> : vector<8x8xf32>
    %89 = tpu.matmul %88, %74, %cst_28 {dimension_numbers = #tpu.dot_dimension_numbers<[1], [0], [0], [1], [0, 0, 1, 1], [], []>} : vector<8x8xf32>, vector<8x8xf32>, vector<8x8xf32> -> vector<8x8xf32>
    %90 = vector.extract_strided_slice %41 {offsets = [0, 16], sizes = [8, 8], strides = [1, 1]} : vector<8x32xf32> to vector<8x8xf32>
    %91 = vector.extract_strided_slice %42 {offsets = [0, 16], sizes = [8, 8], strides = [1, 1]} : vector<8x32xf32> to vector<8x8xf32>
    %92 = vector.extract_strided_slice %43 {offsets = [0, 16], sizes = [8, 8], strides = [1, 1]} : vector<8x32xf32> to vector<8x8xf32>
    %cst_29 = arith.constant dense<0.000000e+00> : vector<8x8xf32>
    %93 = tpu.matmul %90, %91, %cst_29 {dimension_numbers = #tpu.dot_dimension_numbers<[1], [1], [0], [0], [0, 0, 1, 0], [], []>} : vector<8x8xf32>, vector<8x8xf32>, vector<8x8xf32> -> vector<8x8xf32>
    %cst_30 = arith.constant 0.353553385 : f32
    %94 = vector.broadcast %cst_30 : f32 to vector<8x8xf32>
    %95 = arith.mulf %93, %94 : vector<8x8xf32>
    %96 = arith.addf %95, %53 : vector<8x8xf32>
    %cst_31 = arith.constant dense<0xFF800000> : vector<8xf32>
    %97 = vector.multi_reduction <maximumf>, %96, %cst_31 [1] : vector<8x8xf32> to vector<8xf32>
    %98 = vector.shape_cast %97 : vector<8xf32> to vector<8x1xf32>
    %99 = vector.broadcast %98 : vector<8x1xf32> to vector<8x8xf32>
    %100 = arith.subf %96, %99 : vector<8x8xf32>
    %101 = math.exp %100 : vector<8x8xf32>
    %cst_32 = arith.constant dense<0.000000e+00> : vector<8xf32>
    %102 = vector.multi_reduction <add>, %101, %cst_32 [1] : vector<8x8xf32> to vector<8xf32>
    %103 = vector.shape_cast %102 : vector<8xf32> to vector<8x1xf32>
    %104 = tpu.reciprocal %103 {approx = true} : vector<8x1xf32> -> vector<8x1xf32>
    %105 = vector.broadcast %104 : vector<8x1xf32> to vector<8x8xf32>
    %106 = arith.mulf %101, %105 : vector<8x8xf32>
    %cst_33 = arith.constant dense<0.000000e+00> : vector<8x8xf32>
    %107 = tpu.matmul %106, %92, %cst_33 {dimension_numbers = #tpu.dot_dimension_numbers<[1], [0], [0], [1], [0, 0, 1, 1], [], []>} : vector<8x8xf32>, vector<8x8xf32>, vector<8x8xf32> -> vector<8x8xf32>
    %108 = vector.extract_strided_slice %41 {offsets = [0, 24], sizes = [8, 8], strides = [1, 1]} : vector<8x32xf32> to vector<8x8xf32>
    %109 = vector.extract_strided_slice %42 {offsets = [0, 24], sizes = [8, 8], strides = [1, 1]} : vector<8x32xf32> to vector<8x8xf32>
    %110 = vector.extract_strided_slice %43 {offsets = [0, 24], sizes = [8, 8], strides = [1, 1]} : vector<8x32xf32> to vector<8x8xf32>
    %cst_34 = arith.constant dense<0.000000e+00> : vector<8x8xf32>
    %111 = tpu.matmul %108, %109, %cst_34 {dimension_numbers = #tpu.dot_dimension_numbers<[1], [1], [0], [0], [0, 0, 1, 0], [], []>} : vector<8x8xf32>, vector<8x8xf32>, vector<8x8xf32> -> vector<8x8xf32>
    %cst_35 = arith.constant 0.353553385 : f32
    %112 = vector.broadcast %cst_35 : f32 to vector<8x8xf32>
    %113 = arith.mulf %111, %112 : vector<8x8xf32>
    %114 = arith.addf %113, %53 : vector<8x8xf32>
    %cst_36 = arith.constant dense<0xFF800000> : vector<8xf32>
    %115 = vector.multi_reduction <maximumf>, %114, %cst_36 [1] : vector<8x8xf32> to vector<8xf32>
    %116 = vector.shape_cast %115 : vector<8xf32> to vector<8x1xf32>
    %117 = vector.broadcast %116 : vector<8x1xf32> to vector<8x8xf32>
    %118 = arith.subf %114, %117 : vector<8x8xf32>
    %119 = math.exp %118 : vector<8x8xf32>
    %cst_37 = arith.constant dense<0.000000e+00> : vector<8xf32>
    %120 = vector.multi_reduction <add>, %119, %cst_37 [1] : vector<8x8xf32> to vector<8xf32>
    %121 = vector.shape_cast %120 : vector<8xf32> to vector<8x1xf32>
    %122 = tpu.reciprocal %121 {approx = true} : vector<8x1xf32> -> vector<8x1xf32>
    %123 = vector.broadcast %122 : vector<8x1xf32> to vector<8x8xf32>
    %124 = arith.mulf %119, %123 : vector<8x8xf32>
    %cst_38 = arith.constant dense<0.000000e+00> : vector<8x8xf32>
    %125 = tpu.matmul %124, %110, %cst_38 {dimension_numbers = #tpu.dot_dimension_numbers<[1], [0], [0], [1], [0, 0, 1, 1], [], []>} : vector<8x8xf32>, vector<8x8xf32>, vector<8x8xf32> -> vector<8x8xf32>
    %126 = tpu.concatenate %71, %89, %107, %125 in 1 : vector<8x8xf32>, vector<8x8xf32>, vector<8x8xf32>, vector<8x8xf32> -> vector<8x32xf32>
    %c0_39 = arith.constant 0 : index
    %c0_40 = arith.constant 0 : index
    %c0_41 = arith.constant 0 : index
    %127 = vector.load %arg5[%c0_39, %c0_40, %c0_41] : memref<1x32x32xf32, #tpu.memory_space<vmem>>, vector<1x32x32xf32>
    %128 = vector.shape_cast %127 : vector<1x32x32xf32> to vector<32x32xf32>
    %cst_42 = arith.constant dense<0.000000e+00> : vector<8x32xf32>
    %129 = tpu.matmul %126, %128, %cst_42 {dimension_numbers = #tpu.dot_dimension_numbers<[1], [0], [0], [1], [0, 0, 1, 1], [], []>} : vector<8x32xf32>, vector<32x32xf32>, vector<8x32xf32> -> vector<8x32xf32>
    %130 = vector.broadcast %7 : vector<1x32xf32> to vector<8x32xf32>
    %131 = arith.addf %129, %130 : vector<8x32xf32>
    %132 = arith.addf %3, %131 : vector<8x32xf32>
    %cst_43 = arith.constant dense<0.000000e+00> : vector<8xf32>
    %133 = vector.multi_reduction <add>, %132, %cst_43 [1] : vector<8x32xf32> to vector<8xf32>
    %134 = vector.shape_cast %133 : vector<8xf32> to vector<8x1xf32>
    %cst_44 = arith.constant 3.200000e+01 : f32
    %135 = vector.broadcast %cst_44 : f32 to vector<8x1xf32>
    %136 = arith.divf %134, %135 : vector<8x1xf32>
    %137 = vector.broadcast %136 : vector<8x1xf32> to vector<8x32xf32>
    %138 = arith.subf %132, %137 : vector<8x32xf32>
    %139 = arith.mulf %138, %138 : vector<8x32xf32>
    %cst_45 = arith.constant dense<0.000000e+00> : vector<8xf32>
    %140 = vector.multi_reduction <add>, %139, %cst_45 [1] : vector<8x32xf32> to vector<8xf32>
    %141 = vector.shape_cast %140 : vector<8xf32> to vector<8x1xf32>
    %cst_46 = arith.constant 3.200000e+01 : f32
    %142 = vector.broadcast %cst_46 : f32 to vector<8x1xf32>
    %143 = arith.divf %141, %142 : vector<8x1xf32>
    %144 = vector.broadcast %136 : vector<8x1xf32> to vector<8x32xf32>
    %145 = arith.subf %132, %144 : vector<8x32xf32>
    %cst_47 = arith.constant 9.99999997E-7 : f32
    %146 = vector.broadcast %cst_47 : f32 to vector<8x1xf32>
    %147 = arith.addf %143, %146 : vector<8x1xf32>
    %148 = math.rsqrt %147 : vector<8x1xf32>
    %149 = vector.broadcast %148 : vector<8x1xf32> to vector<8x32xf32>
    %150 = arith.mulf %145, %149 : vector<8x32xf32>
    %151 = vector.broadcast %12 : vector<1x32xf32> to vector<8x32xf32>
    %152 = arith.mulf %150, %151 : vector<8x32xf32>
    %153 = vector.broadcast %13 : vector<1x32xf32> to vector<8x32xf32>
    %154 = arith.addf %152, %153 : vector<8x32xf32>
    %c0_48 = arith.constant 0 : index
    %c0_49 = arith.constant 0 : index
    %c0_50 = arith.constant 0 : index
    %155 = vector.load %arg6[%c0_48, %c0_49, %c0_50] : memref<1x32x64xf32, #tpu.memory_space<vmem>>, vector<1x32x64xf32>
    %156 = vector.shape_cast %155 : vector<1x32x64xf32> to vector<32x64xf32>
    %cst_51 = arith.constant dense<0.000000e+00> : vector<8x64xf32>
    %157 = tpu.matmul %154, %156, %cst_51 {dimension_numbers = #tpu.dot_dimension_numbers<[1], [0], [0], [1], [0, 0, 1, 1], [], []>} : vector<8x32xf32>, vector<32x64xf32>, vector<8x64xf32> -> vector<8x64xf32>
    %158 = vector.broadcast %8 : vector<1x64xf32> to vector<8x64xf32>
    %159 = arith.addf %157, %158 : vector<8x64xf32>
    %cst_52 = arith.constant 0.000000e+00 : f32
    %160 = vector.broadcast %cst_52 : f32 to vector<8x64xf32>
    %161 = arith.maximumf %159, %160 : vector<8x64xf32>
    %c0_53 = arith.constant 0 : index
    %c0_54 = arith.constant 0 : index
    %c0_55 = arith.constant 0 : index
    %162 = vector.load %arg7[%c0_53, %c0_54, %c0_55] : memref<1x64x32xf32, #tpu.memory_space<vmem>>, vector<1x64x32xf32>
    %163 = vector.shape_cast %162 : vector<1x64x32xf32> to vector<64x32xf32>
    %cst_56 = arith.constant dense<0.000000e+00> : vector<8x32xf32>
    %164 = tpu.matmul %161, %163, %cst_56 {dimension_numbers = #tpu.dot_dimension_numbers<[1], [0], [0], [1], [0, 0, 1, 1], [], []>} : vector<8x64xf32>, vector<64x32xf32>, vector<8x32xf32> -> vector<8x32xf32>
    %165 = vector.broadcast %9 : vector<1x32xf32> to vector<8x32xf32>
    %166 = arith.addf %164, %165 : vector<8x32xf32>
    %167 = arith.addf %132, %166 : vector<8x32xf32>
    %c0_57 = arith.constant 0 : index
    %c0_58 = arith.constant 0 : index
    %168 = vector.load %arg14[%c0_57, %c0_58] : memref<8x32xf32, #tpu.memory_space<vmem>>, vector<8x32xf32>
    tpu.vector_store %arg14[%c0_57, %c0_58], %167 {strides = array<i32>} : memref<8x32xf32, #tpu.memory_space<vmem>>, vector<8x32xf32>,
    %c1_i32 = arith.constant 1 : i32
    %169 = arith.cmpi eq, %arg1, %c1_i32 : i32
    %170 = arith.extui %169 : i1 to i32
    %c0_i32_59 = arith.constant 0 : i32
    %171 = arith.cmpi ne, %170, %c0_i32_59 : i32
    scf.if %171 {
      %c0_60 = arith.constant 0 : index
      %c0_61 = arith.constant 0 : index
      %172 = vector.load %arg9[%c0_60, %c0_61] : memref<2x32xf32, #tpu.memory_space<vmem>>, vector<1x32xf32>
      %c1 = arith.constant 1 : index
      %c0_62 = arith.constant 0 : index
      %173 = vector.load %arg9[%c1, %c0_62] : memref<2x32xf32, #tpu.memory_space<vmem>>, vector<1x32xf32>
      %cst_63 = arith.constant dense<0.000000e+00> : vector<8xf32>
      %174 = vector.multi_reduction <add>, %167, %cst_63 [1] : vector<8x32xf32> to vector<8xf32>
      %175 = vector.shape_cast %174 : vector<8xf32> to vector<8x1xf32>
      %cst_64 = arith.constant 3.200000e+01 : f32
      %176 = vector.broadcast %cst_64 : f32 to vector<8x1xf32>
      %177 = arith.divf %175, %176 : vector<8x1xf32>
      %178 = vector.broadcast %177 : vector<8x1xf32> to vector<8x32xf32>
      %179 = arith.subf %167, %178 : vector<8x32xf32>
      %180 = arith.mulf %179, %179 : vector<8x32xf32>
      %cst_65 = arith.constant dense<0.000000e+00> : vector<8xf32>
      %181 = vector.multi_reduction <add>, %180, %cst_65 [1] : vector<8x32xf32> to vector<8xf32>
      %182 = vector.shape_cast %181 : vector<8xf32> to vector<8x1xf32>
      %cst_66 = arith.constant 3.200000e+01 : f32
      %183 = vector.broadcast %cst_66 : f32 to vector<8x1xf32>
      %184 = arith.divf %182, %183 : vector<8x1xf32>
      %185 = vector.broadcast %177 : vector<8x1xf32> to vector<8x32xf32>
      %186 = arith.subf %167, %185 : vector<8x32xf32>
      %cst_67 = arith.constant 9.99999997E-7 : f32
      %187 = vector.broadcast %cst_67 : f32 to vector<8x1xf32>
      %188 = arith.addf %184, %187 : vector<8x1xf32>
      %189 = math.rsqrt %188 : vector<8x1xf32>
      %190 = vector.broadcast %189 : vector<8x1xf32> to vector<8x32xf32>
      %191 = arith.mulf %186, %190 : vector<8x32xf32>
      %192 = vector.broadcast %172 : vector<1x32xf32> to vector<8x32xf32>
      %193 = arith.mulf %191, %192 : vector<8x32xf32>
      %194 = vector.broadcast %173 : vector<1x32xf32> to vector<8x32xf32>
      %195 = arith.addf %193, %194 : vector<8x32xf32>
      %c0_68 = arith.constant 0 : index
      %c0_69 = arith.constant 0 : index
      %196 = vector.load %arg10[%c0_68, %c0_69] : memref<64x32xf32, #tpu.memory_space<vmem>>, vector<64x32xf32>
      %cst_70 = arith.constant dense<0.000000e+00> : vector<8x64xf32>
      %197 = tpu.matmul %195, %196, %cst_70 {dimension_numbers = #tpu.dot_dimension_numbers<[1], [1], [0], [0], [0, 0, 1, 0], [], []>} : vector<8x32xf32>, vector<64x32xf32>, vector<8x64xf32> -> vector<8x64xf32>
      %c0_71 = arith.constant 0 : index
      %c0_72 = arith.constant 0 : index
      %198 = vector.load %arg11[%c0_71, %c0_72] : memref<1x64xf32, #tpu.memory_space<vmem>>, vector<1x64xf32>
      %199 = vector.broadcast %198 : vector<1x64xf32> to vector<8x64xf32>
      %200 = arith.addf %197, %199 : vector<8x64xf32>
      %c0_73 = arith.constant 0 : index
      %c0_74 = arith.constant 0 : index
      %c0_75 = arith.constant 0 : index
      %201 = vector.load %arg12[%c0_73, %c0_74, %c0_75] : memref<1x8x64xf32, #tpu.memory_space<vmem>>, vector<1x8x64xf32>
      %202 = vector.shape_cast %201 : vector<1x8x64xf32> to vector<8x64xf32>
      %203 = vector.shape_cast %200 : vector<8x64xf32> to vector<1x8x64xf32>
      tpu.vector_store %arg12[%c0_73, %c0_74, %c0_75], %203 {strides = array<i32>} : memref<1x8x64xf32, #tpu.memory_space<vmem>>, vector<1x8x64xf32>,
    } else {
    }
    return
  }
  func.func @transform_0(%arg0: i32, %arg1: i32) -> (i32, i32, i32) {
    %c0_i32 = arith.constant 0 : i32
    %c0_i32_0 = arith.constant 0 : i32
    %c0_i32_1 = arith.constant 0 : i32
    return %arg0, %c0_i32, %c0_i32_0 : i32, i32, i32
  }
  func.func @transform_1(%arg0: i32, %arg1: i32) -> (i32, i32) {
    %c0_i32 = arith.constant 0 : i32
    %c0_i32_0 = arith.constant 0 : i32
    %c0_i32_1 = arith.constant 0 : i32
    return %c0_i32, %c0_i32_0 : i32, i32
  }
  func.func @transform_2(%arg0: i32, %arg1: i32) -> (i32, i32, i32) {
    %c0_i32 = arith.constant 0 : i32
    %c0_i32_0 = arith.constant 0 : i32
    %c0_i32_1 = arith.constant 0 : i32
    return %arg1, %c0_i32, %c0_i32_0 : i32, i32, i32
  }
  func.func @transform_3(%arg0: i32, %arg1: i32) -> (i32, i32, i32) {
    %c0_i32 = arith.constant 0 : i32
    %c0_i32_0 = arith.constant 0 : i32
    %c0_i32_1 = arith.constant 0 : i32
    return %arg1, %c0_i32, %c0_i32_0 : i32, i32, i32
  }
  func.func @transform_4(%arg0: i32, %arg1: i32) -> (i32, i32, i32) {
    %c0_i32 = arith.constant 0 : i32
    %c0_i32_0 = arith.constant 0 : i32
    %c0_i32_1 = arith.constant 0 : i32
    return %arg1, %c0_i32, %c0_i32_0 : i32, i32, i32
  }
  func.func @transform_5(%arg0: i32, %arg1: i32) -> (i32, i32, i32) {
    %c0_i32 = arith.constant 0 : i32
    %c0_i32_0 = arith.constant 0 : i32
    %c0_i32_1 = arith.constant 0 : i32
    return %arg1, %c0_i32, %c0_i32_0 : i32, i32, i32
  }
  func.func @transform_6(%arg0: i32, %arg1: i32) -> (i32, i32, i32) {
    %c0_i32 = arith.constant 0 : i32
    %c0_i32_0 = arith.constant 0 : i32
    %c0_i32_1 = arith.constant 0 : i32
    return %arg1, %c0_i32, %c0_i32_0 : i32, i32, i32
  }
  func.func @transform_7(%arg0: i32, %arg1: i32) -> (i32, i32) {
    %c0_i32 = arith.constant 0 : i32
    %c0_i32_0 = arith.constant 0 : i32
    %c0_i32_1 = arith.constant 0 : i32
    return %c0_i32, %c0_i32_0 : i32, i32
  }
  func.func @transform_8(%arg0: i32, %arg1: i32) -> (i32, i32) {
    %c0_i32 = arith.constant 0 : i32
    %c0_i32_0 = arith.constant 0 : i32
    %c0_i32_1 = arith.constant 0 : i32
    return %c0_i32, %c0_i32_0 : i32, i32
  }
  func.func @transform_9(%arg0: i32, %arg1: i32) -> (i32, i32) {
    %c0_i32 = arith.constant 0 : i32
    %c0_i32_0 = arith.constant 0 : i32
    %c0_i32_1 = arith.constant 0 : i32
    return %c0_i32, %c0_i32_0 : i32, i32
  }
  func.func @transform_10(%arg0: i32, %arg1: i32) -> (i32, i32, i32) {
    %c0_i32 = arith.constant 0 : i32
    %c0_i32_0 = arith.constant 0 : i32
    %c0_i32_1 = arith.constant 0 : i32
    return %arg0, %c0_i32, %c0_i32_0 : i32, i32, i32
  }
  func.func @transform_11(%arg0: i32, %arg1: i32) -> (i32, i32, i32, i32) {
    %c0_i32 = arith.constant 0 : i32
    %c0_i32_0 = arith.constant 0 : i32
    %c0_i32_1 = arith.constant 0 : i32
    return %arg1, %arg0, %c0_i32, %c0_i32_0 : i32, i32, i32, i32
  }
}

</mosaic_0001>

<bundles_post_ra>
// kernel: ctrl_forward.1
= control target key start
LH: loop header
LB: loop body
LE: loop exit
PB: predicated region body
PF: predicated region fallthrough
CT: control target
= control target key end

     0   :  { %s3009_s0 = inlined_call_operand.vmem [shape: s32[2,8,1], index: 0, kind: input, shape index: {}]   ;;  %s3010_s1 = inlined_call_operand.vmem [shape: f32[8,32], index: 1, kind: input, shape index: {}]   ;;  %s3011_s2 = inlined_call_operand.vmem [shape: f32[2,32,96], index: 2, kind: input, shape index: {}]   ;;  %s3012_s3 = inlined_call_operand.vmem [shape: f32[2,32,32], index: 3, kind: input, shape index: {}]   ;;  %s3013_s4 = inlined_call_operand.vmem [shape: f32[2,32,64], index: 4, kind: input, shape index: {}]   ;;  %s3014_s5 = inlined_call_operand.vmem [shape: f32[2,64,32], index: 5, kind: input, shape index: {}]   ;;  %s3015_s6 = inlined_call_operand.vmem [shape: f32[2,8,96], index: 6, kind: input, shape index: {}]   ;;  %s3016_s7 = inlined_call_operand.vmem [shape: f32[2,32], index: 7, kind: input, shape index: {}]   ;;  %s3017_s8 = inlined_call_operand.vmem [shape: f32[64,32], index: 8, kind: input, shape index: {}]   ;;  %s3018_s9 = inlined_call_operand.vmem [shape: f32[1,64], index: 9, kind: input, shape index: {}]   ;;  %s3019_s10 = inlined_call_operand.hbm [shape: f32[2,8,64], index: 10, kind: output, shape index: {0}]   ;;  %s3020_s11 = inlined_call_operand.vmem [shape: f32[2,2,8,64], index: 11, kind: output, shape index: {1}]  }
   0x1   :  { %3035 = sst [smem:[#allocation18_spill]] %s3009_s0 }
   0x2   :  { %3036 = sst [smem:[#allocation19_spill]] %s3011_s2 }
   0x3   :  { %3037 = sst [smem:[#allocation20_spill]] %s3012_s3 }
   0x4   :  { %3038 = sst [smem:[#allocation21_spill]] %s3018_s9 }
   0x5   :  { %3039 = sst [smem:[#allocation22_spill]] %s3019_s10 }
   0x6   :  { %17 = vsyncpa [#allocation4], 0 }
   0x7   :  { %19 = vsyncpa [#allocation4 + $0x1], 0  ;;  %s2624_s17 = smov 0   ;;  %s2626_s18 = smov 0  }
   0x8   :  { %s2628_s19 = smov 0   ;;  %s2630_s20 = smov 0  }
   0x9   :  { %s2632_s21 = smov 0   ;;  %s2634_s22 = smov 0  }
   0xa   :  { %s2636_s23 = smov 0   ;;  %s2638_s24 = smov 0  }
   0xb LB: > { %3040 = sst [smem:[#allocation6_spill]] %s2509_s17  ;;  %s2021_s25 = sadd.s32 4294967295, %s2537_s24   ;;  %s2537_s24 = sphi %s2638_s24, %s25_s24   ;;  %s2533_s23 = sphi %s2636_s23, %s3075_s23   ;;  %s2529_s22 = sphi %s2634_s22, %s3074_s22   ;;  %s2525_s21 = sphi %s2632_s21, %s3073_s21   ;;  %s2521_s20 = sphi %s2630_s20, %s3072_s20   ;;  %s2517_s19 = sphi %s2628_s19, %s3071_s19   ;;  %s2513_s18 = sphi %s2626_s18, %s3070_s18   ;;  %s2509_s17 = sphi %s2624_s17, %s3069_s17  }
   0xc   : > { %3041 = sst [smem:[#allocation7_spill]] %s2513_s18  ;;  %s2022_s26 = sadd.s32 4294967294, %s2537_s24  }
   0xd   : > { %3042 = sst [smem:[#allocation8_spill]] %s2517_s19  ;;  %s34_s27 = sadd.s32 1, %s2529_s22 }
   0xe   : > { %3043 = sst [smem:[#allocation9_spill]] %s2525_s21  ;;  %p35_p0 = scmp.ge.s32.totalorder %s34_s27, 2 }
   0xf   : > { %3044 = sst [smem:[#allocation10_spill]] %s2529_s22  ;;  %s37_s28 = sadd.s32 1, %s2533_s23 }
  0x10   : > { %3045 = sst [smem:[#allocation11_spill]] %s2533_s23  ;;  %p294_p1 = scmp.ne.s32.totalorder %s2517_s19, %s2513_s18 }
  0x11   : > { %3046 = sst [smem:[#allocation12_spill]] %s2537_s24  ;;  %p295_p2 = scmp.eq.s32.totalorder %s2021_s25, 3 }
  0x12   : > { %s3077_s27 = smov (%p35_p0, %s34_s27), 0  ;;  %s3079_s28 = smov (!%p35_p0, %s37_s28), %s2533_s23 }
  0x13   : > { %3047 = sst [smem:[#allocation13_spill]] %s3077_s27  ;;  %p2673_p3 = por %p295_p2, %p294_p1 }
  0x14   : > { %p300_p4 = scmp.ne.s32.totalorder %s2513_s18, %s2509_s17  ;;  %p39_p5 = scmp.ge.s32.totalorder %s3079_s28, 2 }
  0x15   : > { %s3048_s29 = scalar_select %p2673_p3, 1, 0 }
  0x16   : > { %p301_p6 = scmp.eq.s32.totalorder %s2022_s26, 3  ;;  %p2025_p7 = scmp.ge.s32.totalorder %s2537_s24, 1 }
  0x17   : > { %3049 = sst [smem:[#allocation14_spill]] %s3048_s29  ;;  %p405_p8 = scmp.lt.s32.totalorder %s2537_s24, 5 }
  0x18   : > { %s3081_s28 = smov (%p39_p5, %s3079_s28), 0  ;;  %p2683_p9 = por %p301_p6, %p300_p4 }
  0x19   : > { %3050 = sst [smem:[#allocation15_spill]] %s3081_s28  ;;  %p406_p10 = pnand %p2025_p7, %p405_p8 }
  0x1a   : > { %s3051_s30 = scalar_select %p2683_p9, 1, 0 }
  0x1b   : > { %s281_s12 = ssub.s32 %s2533_s23, %s3081_s28  ;;  %s284_s13 = sadd.s32 1, %s2517_s19 }
  0x1c   : > { %3052 = sst [smem:[#allocation16_spill]] %s3051_s30  ;;  %p282_p11 = scmp.eq.s32.totalorder %s281_s12, 0 }
  0x1d   : > { %409 = sbr.rel (%p406_p10) target bundleno = 3430 (0xd66), region = 60  ;;  %s3027_s15 = sand.u32 (!%p406_p10), 1, %s2513_s18  }
  0x1e   : > { %s2691_s14 = scalar_select %p282_p11, %s2517_s19, %s284_s13  }
  0x1f   : > { %p476_p12 = scmp.lt.s32.totalorder (!%p406_p10), %s2525_s21, 1  ;;  %s2697_s16 = sshll.u32 (!%p406_p10), %s3027_s15, 3 }
  0x20   : > { %3053 = sst [smem:[#allocation17_spill]] %s2691_s14  ;;  %p480_p13 = scmp.lt.s32.totalorder (!%p406_p10), %s2521_s20, 1 }
  0x21   : > { %s3054_s0 = sld [smem:[#allocation18_spill]] (!%p406_p10)  ;;  %s3055_s2 = sld [smem:[#allocation19_spill]] (!%p406_p10) }
  0x22   : > { %s3056_s3 = sld [smem:[#allocation20_spill]] (!%p406_p10)  ;;  %p2039_p0 = scmp.ne.s32.totalorder (!%p406_p10), %s2521_s20, 0 }
  0x24   : > { %s477_s25 = scalar_select %p476_p12, %s2525_s21, 1 }
  0x25   : > { %s481_s26 = scalar_select %p480_p13, %s2521_s20, 1 }
  0x26   : > { %s2027_s28 = sshll.u32 %s477_s25, 3  ;;  %v525_v1 = vld [vmem:[%s3017_s8] sm:$0xff] (!%p2039_p0)  ;;  %v526_v2 = vld [vmem:[%s3017_s8 + $0x8] sm:$0xff] (!%p2039_p0)  ;;  %v2539_v3 = vmov (!%p2039_p0), 0   ;;  %v2540_v4 = vmov (!%p2039_p0), 0.0|0.0   ;;  %v527_v6 = vld [vmem:[%s3017_s8 + $0x10] sm:$0xff] (!%p2039_p0)  ;;  %v517_v16 = vlaneseq (!%p2039_p0) }
  0x27   : > { %s479_s27 = scalar_lea.vmem %s3054_s0, %s2027_s28  ;;  %s2075_s23 = sshll.u32 %s481_s26, 5  ;;  %2420 = vset.pattern.permute.xlu0 (!%p2039_p0), %v2539_v3  ;;  %2267 = vmatprep.subr.bf16.mxu0 (!%p2039_p0), %v2540_v4  ;;  %v2268_v5 = vpack.c.bf16 (!%p2039_p0), %v526_v2, %v525_v1  ;;  %v528_v7 = vld [vmem:[%s3017_s8 + $0x18] sm:$0xff] (!%p2039_p0)  ;;  %vm2541_vm0 = vmmov (!%p2039_p0), 0   ;;  %v2542_v9 = vmov (!%p2039_p0), 0.0   ;;  %v529_v10 = vld [vmem:[%s3017_s8 + $0x20] sm:$0xff] (!%p2039_p0)  ;;  %v530_v11 = vld [vmem:[%s3017_s8 + $0x28] sm:$0xff] (!%p2039_p0) }
  0x28   : > { %s2708_s19 = scalar_lea.vmem %s3055_s2, %s2075_s23  ;;  %s2713_s15 = scalar_lea.vmem %s3056_s3, %s2075_s23  ;;  %v516_v0 = vld [vmem:[%s479_s27] sm:$0xff] (!%p2039_p0)  ;;  %v2271_v8 = vpack.c.bf16 (!%p2039_p0), %v528_v7, %v527_v6  ;;  %2153 = vmatprep.mubr.msk.f32.mxu0 (!%p2039_p0), %vm2541_vm0, %v2542_v9  ;;  %v2274_v12 = vpack.c.bf16 (!%p2039_p0), %v530_v11, %v529_v10  ;;  %v531_v13 = vld [vmem:[%s3017_s8 + $0x30] sm:$0xff] (!%p2039_p0)  ;;  %v532_v14 = vld [vmem:[%s3017_s8 + $0x38] sm:$0xff] (!%p2039_p0)  ;;  %v518_v17 = vand.u32 (!%p2039_p0), 127, %v517_v16  ;;  %vm533_vm1 = vcmask (!%p2039_p0), 523264  }
  0x29   : > { %s2718_s29 = scalar_lea.vmem %s3013_s4, %s2075_s23  ;;  %s2078_s18 = sshll.u32 %s481_s26, 6  ;;  %520 = vperm.xlu0 (!%p2039_p0), %2420, %v516_v0   ;;  %2269 = vmatpush3.bf16.msra.mxu0 (!%p2039_p0), %v2268_v5  ;;  %v2277_v15 = vpack.c.bf16 (!%p2039_p0), %v532_v14, %v531_v13  ;;  %v608_v21 = vld [vmem:[%s3010_s1] sm:$0xff] (!%p2039_p0)  ;;  %vm610_vm3 = vcmask (!%p2039_p0), 261120  }
  0x2a   : > { %s2723_s28 = scalar_lea.vmem %s3014_s5, %s2078_s18  ;;  %s2036_s13 = sshll.u32 %s481_s26, 3  ;;  %2270 = vmatprep.subr.bf16.mxu0 (!%p2039_p0), %v2540_v4 }
  0x2b   : > { %s2728_s0 = scalar_lea.vmem %s3015_s6, %s2036_s13  ;;  %s2037_s17 = sshll.u32 %s481_s26, 1 }
  0x2c   : > { %s509_s30 = sadd.s32 %s2037_s17, %s477_s25  ;;  %s465_s23 = scalar_lea.vmem [#allocation3], %s2697_s16 }
  0x2d   : > { %s2038_s2 = sshll.u32 %s509_s30, 3  ;;  %515 = sbr.rel (%p2039_p0) target bundleno = 388 (0x184), region = 64  ;;  %2272 = vmatpush3.bf16.msra.mxu0 (!%p2039_p0), %v2271_v8 }
  0x2e   : > { %s2733_s10 = scalar_lea.vmem %s3020_s11, %s2038_s2  ;;  %2273 = vmatprep.subr.bf16.mxu0 (!%p2039_p0), %v2540_v4 }
  0x31   : > { %2275 = vmatpush3.bf16.msra.mxu0 (!%p2039_p0), %v2274_v12 }
  0x32   : > { %2276 = vmatprep.subr.bf16.mxu0 (!%p2039_p0), %v2540_v4 }
  0x35   : > { %2278 = vmatpush3.bf16.msra.mxu0 %v2277_v15 }
  0xa8   : > { %v521_v18 = vpop.permute.xlu0 %520 }
  0xa9   : > { %vm522_vm2 = vcmp.eq.s32.totalorder %v518_v17, %v521_v18 }
  0xaa   : > { %v2040_v19 = vsel %vm522_vm2, 1.0, %v2542_v9 }
  0xab   : > { %2154 = vmatmul.mubr.msk.f32.vlgmr.msra.gmra.mrb[0].mxu0 %vm533_vm1, %v2040_v19 }
 0x17e   : > { %v603_v20 = vpop.f32.mrb[0].mxu0 }
 0x17f   : > { %v607_v22 = vmul.f32 5.656854, %v603_v20  ;;  %v2155_v23 = vpop.f32.mrb[1].mxu0 }
 0x181   : > { %v609_v24 = vadd.f32 %v608_v21, %v607_v22 }
 0x183   : > { %611 = vst.msk [vmem:[#allocation2] sm:$0xff] %vm610_vm3, %v609_v24 }
 0x184 PF: > { %vm614_vm4 = vcmask 261120   ;;  %v639_v32 = vld [vmem:[%s2708_s19] sm:$0xff]  ;;  %v640_v33 = vld [vmem:[%s2708_s19 + $0x8] sm:$0xff]  ;;  %v641_v34 = vld [vmem:[%s2708_s19 + $0x10] sm:$0xff]  ;;  %v2543_v35 = vmov 0.0|0.0   ;;  %vm2544_vm5 = vmmov 0   ;;  %v629_v42 = vlaneseq }
 0x185   : > { %2279 = vmatprep.subr.bf16.mxu1 %v2543_v35  ;;  %v2280_v36 = vpack.c.bf16 %v640_v33, %v639_v32  ;;  %v642_v37 = vld [vmem:[%s2708_s19 + $0x18] sm:$0xff]  ;;  %v2545_v38 = vmov 0.0   ;;  %v2786_v46 = vld [vmem:[%s2728_s0] sm:$0xff]  ;;  %s2546_s0 = smov 120   ;;  %s2547_s19 = smov 96   ;;  %vm724_vm6 = vcmask 523264  }
 0x186   : > { %2164 = vmatprep.mubr.msk.f32.mxu1 %vm2544_vm5, %v2545_v38  ;;  %2177 = vmatprep.subr.mxu0 %v2545_v38  ;;  %v2283_v39 = vpack.c.bf16 %v642_v37, %v641_v34  ;;  %v2782_v44 = vshrl.u32 %v629_v42, 7  ;;  %s2548_s12 = smov 88   ;;  %s2549_s2 = smov 80   ;;  %vm732_vm7 = vcmask 64512   ;;  %v729_v2 = vand.u32 127, %v629_v42 }
 0x187   : > { %2179 = vmatprep.mubr.msk.f32.mxu0 %vm2544_vm5, %v2545_v38  ;;  %2281 = vmatpush3.bf16.msra.mxu1 %v2280_v36  ;;  %s2550_s3 = smov 112   ;;  %s2551_s9 = smov 72   ;;  %vm1410_vm9 = vcmask 130048   ;;  %vm1412_vm10 = vcmask 195584  }
 0x188   : > { %2282 = vmatprep.subr.bf16.mxu1 %v2543_v35  ;;  %v631_v45 = vsub.s32 4, %v2782_v44  ;;  %v636_v47 = vsub.s32 5, %v2782_v44  ;;  %v645_v54 = vsub.s32 0, %v2782_v44  ;;  %s2552_s25 = smov 104   ;;  %vm730_vm8 = vcmp.gt.s32.totalorder %v729_v2, %v2782_v44  ;;  %s2554_s27 = smov 48   ;;  %v1415_v2 = vld [vmem:[%s2713_s15 + $0x8] sm:$0xff] }
 0x189   : > { %v731_v4 = vsel %vm730_vm8, -10000.0, %v2545_v38  ;;  %s2555_s26 = smov 40   ;;  %s2556_s13 = smov 56  }
 0x18a   : > { %v2764_v25 = vld [vmem:[#allocation2] sm:$0xff]  ;;  %v632_v48 = vrot.slane %v2786_v46, %v631_v45  ;;  %v637_v51 = vrot.slane %v2786_v46, %v636_v47  ;;  %v646_v55 = vrot.slane %v2786_v46, %v645_v54  ;;  %s2557_s22 = smov 8   ;;  %s2558_s14 = smov 16  }
 0x18b   : > { %v615_v26 = vsel %vm614_vm4, %v2764_v25, 0.0  ;;  %2284 = vmatpush3.bf16.msra.mxu1 %v2283_v39  ;;  %s2559_s17 = smov 24   ;;  %p2058_p1 = scmp.ne.s32.totalorder %s2521_s20, 1 }
 0x18c   : > { %616 = vadd.xlane.f32.xlu0 %v615_v26  ;;  %2167 = vmatprep.subr.mxu1 %v2545_v38  ;;  %vm2910_vm11 = vmpackc.low (!%p2058_p1), %vm614_vm4, %vm614_vm4  ;;  %vm2561_vm12 = vmmov (!%p2058_p1), 0  }
 0x219   : > { %v617_v27 = vpop.xlane.xlu0 %616 }
 0x21a   : > { %v619_v28 = vmul.f32 0.03125, %v617_v27 }
 0x21c   : > { %v620_v29 = vsub.f32 %v2764_v25, %v619_v28 }
 0x21e   : > { %v621_v30 = vmul.f32 %v620_v29, %v620_v29 }
 0x220   : > { %v622_v31 = vsel %vm614_vm4, %v621_v30, 0.0 }
 0x221   : > { %623 = vadd.xlane.f32.xlu0 %v622_v31 }
 0x2ae   : > { %v624_v40 = vpop.xlane.xlu0 %623 }
 0x2af   : > { %v625_v41 = vmul.f32 0.03125, %v624_v40 }
 0x2b1   : > { %v626_v43 = vadd.f32 1e-06, %v625_v41 }
 0x2b3   : > { %2421 = vrsqrt.f32 %v626_v43 }
 0x2bd   : > { %v2422_v49 = vpop.eup %2421 }
 0x2be   : > { %v628_v50 = vmul.f32 %v2422_v49, %v620_v29 }
 0x2c0   : > { %v633_v52 = vmul.f32 %v632_v48, %v628_v50 }
 0x2c2   : > { %v638_v53 = vadd.f32 %v637_v51, %v633_v52 }
 0x2c4   : > { %2165 = vmatmul.mubr.msk.f32.vlgmr.msra.gmra.mrb[0].mxu1 %vm614_vm4, %v638_v53 }
 0x2c5   : > { %2169 = vmatprep.mubr.msk.f32.mxu1 %vm2544_vm5, %v2545_v38 }
 0x397   : > { %v716_v56 = vpop.f32.mrb[0].mxu1 }
 0x398   : > { %v2796_v57 = vadd.f32 %v716_v56, %v646_v55  ;;  %v2166_v58 = vpop.f32.mrb[1].mxu1 }
 0x39a   : > { %896 = vrot.lane.b32.xlu0 %v2796_v57, %s2546_s0  ;;  %721 = vrot.lane.b32.xlu1 %v2796_v57, %s2547_s19 }
 0x39e   : > { %898 = vrot.lane.b32.xlu1 %v2796_v57, %s2548_s12 }
 0x3a2   : > { %1065 = vrot.lane.b32.xlu1 %v2796_v57, %s2549_s2 }
 0x3a6   : > { %1063 = vrot.lane.b32.xlu1 %v2796_v57, %s2550_s3 }
 0x3aa   : > { %1232 = vrot.lane.b32.xlu1 %v2796_v57, %s2551_s9 }
 0x3ae   : > { %1230 = vrot.lane.b32.xlu1 %v2796_v57, %s2552_s25 }
 0x40c   : > { %v722_v59 = vpop.permute.xlu1 %721  ;;  %v897_v61 = vpop.permute.xlu0 %896 }
 0x40d   : > { %725 = vst.msk [vmem:[%s2733_s10] sm:$0xff] %vm724_vm6, %v722_v59  ;;  %2168 = vmatpush3.xpose.msk.msra.mxu1 %vm732_vm7, %v722_v59  ;;  %s2553_s10 = smov 64  }
 0x40e   : > { %2172 = vmatprep.subr.mxu1 %v2545_v38 }
 0x410   : > { %2170 = vmatmul.mubr.msk.f32.vlgmr.msra.gmra.mrb[2].mxu1 %vm732_vm7, %v2796_v57  ;;  %v899_v60 = vpop.permute.xlu1 %898 }
 0x411   : > { %2178 = vmatpush3.xpose.msk.msra.mxu0 %vm732_vm7, %v899_v60  ;;  %2174 = vmatprep.mubr.msk.f32.mxu1 %vm2544_vm5, %v2545_v38 }
 0x412   : > { %2187 = vmatprep.subr.mxu0 %v2545_v38 }
 0x414   : > { %2180 = vmatmul.mubr.msk.f32.vlgmr.msra.gmra.mrb[0].mxu0 %vm732_vm7, %v897_v61  ;;  %v1066_v62 = vpop.permute.xlu1 %1065 }
 0x415   : > { %2188 = vmatpush3.xpose.msk.msra.mxu0 %vm732_vm7, %v1066_v62  ;;  %2189 = vmatprep.mubr.msk.f32.mxu0 %vm2544_vm5, %v2545_v38 }
 0x416   : > { %2197 = vmatprep.subr.mxu0 %v2545_v38 }
 0x418   : > { %v1064_v63 = vpop.permute.xlu1 %1063 }
 0x419   : > { %2190 = vmatmul.mubr.msk.f32.vlgmr.msra.gmra.mrb[2].mxu0 %vm732_vm7, %v1064_v63 }
 0x41a   : > { %2199 = vmatprep.mubr.msk.f32.mxu0 %vm2544_vm5, %v2545_v38 }
 0x41c   : > { %v1233_v0 = vpop.permute.xlu1 %1232 }
 0x41d   : > { %2198 = vmatpush3.xpose.msk.msra.mxu0 %vm732_vm7, %v1233_v0 }
 0x41e   : > { %2285 = vmatprep.subr.bf16.mxu0 %v2543_v35 }
 0x420   : > { %v1231_v1 = vpop.permute.xlu1 %1230 }
 0x421   : > { %2200 = vmatmul.mubr.msk.f32.vlgmr.msra.gmra.mrb[4].mxu0 %vm732_vm7, %v1231_v1  ;;  %v1414_v1 = vld [vmem:[%s2713_s15] sm:$0xff] }
 0x422   : > { %2215 = vmatprep.mubr.msk.f32.mxu0 %vm2544_vm5, %v2545_v38 }
 0x4e3   : > { %v803_v3 = vpop.f32.mrb[2].mxu1 }
 0x4e4   : > { %v807_v5 = vmul.f32 0.35355338, %v803_v3  ;;  %v2171_v6 = vpop.f32.mrb[3].mxu1  ;;  %v2286_v3 = vpack.c.bf16 %v1415_v2, %v1414_v1 }
 0x4e5   : > { %v1416_v6 = vld [vmem:[%s2713_s15 + $0x10] sm:$0xff] }
 0x4e6   : > { %v808_v7 = vadd.f32 %v807_v5, %v731_v4  ;;  %2287 = vmatpush3.bf16.msra.mxu0 %v2286_v3 }
 0x4e7   : > { %v970_v8 = vpop.f32.mrb[0].mxu0  ;;  %2288 = vmatprep.subr.bf16.mxu0 %v2543_v35 }
 0x4e8   : > { %v974_v9 = vmul.f32 0.35355338, %v970_v8  ;;  %v2181_v10 = vpop.f32.mrb[1].mxu0  ;;  %v809_v11 = vsel %vm732_vm7, %v808_v7, -inf }
 0x4e9   : > { %810 = vmax.xlane.f32.xlu1 %v809_v11 }
 0x4ea   : > { %v975_v12 = vadd.f32 %v974_v9, %v731_v4 }
 0x4ec   : > { %v1137_v13 = vpop.f32.mrb[2].mxu0  ;;  %v976_v14 = vsel %vm732_vm7, %v975_v12, -inf }
 0x4ed   : > { %v1141_v15 = vmul.f32 0.35355338, %v1137_v13  ;;  %977 = vmax.xlane.f32.xlu0 %v976_v14  ;;  %v2191_v16 = vpop.f32.mrb[3].mxu0 }
 0x4ef   : > { %v1142_v17 = vadd.f32 %v1141_v15, %v731_v4 }
 0x4f1   : > { %v1143_v18 = vsel %vm732_vm7, %v1142_v17, -inf }
 0x4f2   : > { %1144 = vmax.xlane.f32.xlu1 %v1143_v18 }
 0x4f4   : > { %v1304_v19 = vpop.f32.mrb[4].mxu0 }
 0x4f5   : > { %v1308_v20 = vmul.f32 0.35355338, %v1304_v19  ;;  %v2201_v21 = vpop.f32.mrb[5].mxu0 }
 0x4f6   : > { %v1420_v21 = vsub.s32 1, %v2782_v44 }
 0x4f7   : > { %v1309_v22 = vadd.f32 %v1308_v20, %v731_v4 }
 0x4f9   : > { %v1310_v23 = vsel %vm732_vm7, %v1309_v22, -inf }
 0x4fa   : > { %1311 = vmax.xlane.f32.xlu0 %v1310_v23 }
 0x503   : > { %820 = vrot.lane.b32.xlu1 %v2796_v57, %s2553_s10 }
 0x576   : > { %v811_v24 = vpop.xlane.xlu1 %810 }
 0x577   : > { %v812_v26 = vsub.f32 %v808_v7, %v811_v24  ;;  %v1417_v7 = vld [vmem:[%s2713_s15 + $0x18] sm:$0xff] }
 0x578   : > { %v2289_v8 = vpack.c.bf16 %v1417_v7, %v1416_v6  ;;  %v1611_v6 = vsub.s32 3, %v2782_v44 }
 0x579   : > { %v813_v27 = vmul.f32 1.442695, %v812_v26 }
 0x57a   : > { %v978_v28 = vpop.xlane.xlu0 %977  ;;  %2290 = vmatpush3.bf16.msra.mxu0 %v2289_v8  ;;  %v1612_v7 = vrot.slane %v2786_v46, %v1611_v6 }
 0x57b   : > { %2423 = vpow2.f32 %v813_v27  ;;  %v979_v29 = vsub.f32 %v975_v12, %v978_v28  ;;  %2297 = vmatprep.subr.bf16.mxu0 %v2543_v35 }
 0x57d   : > { %v980_v30 = vmul.f32 1.442695, %v979_v29 }
 0x57f   : > { %2425 = vpow2.f32 %v980_v30  ;;  %v1145_v31 = vpop.xlane.xlu1 %1144 }
 0x580   : > { %v1146_v32 = vsub.f32 %v1142_v17, %v1145_v31 }
 0x582   : > { %v1147_v33 = vmul.f32 1.442695, %v1146_v32 }
 0x583   : > { %v821_v34 = vpop.permute.xlu1 %820 }
 0x584   : > { %2427 = vpow2.f32 %v1147_v33  ;;  %2173 = vmatpush3.msra.mxu1 %v821_v34  ;;  %v1519_v33 = vld [vmem:[%s2718_s29] sm:$0xff]  ;;  %v1520_v34 = vld [vmem:[%s2718_s29 + $0x8] sm:$0xff] }
 0x585   : > { %v2424_v36 = vpop.eup %2423  ;;  %2182 = vmatprep.subr.mxu1 %v2545_v38 }
 0x586   : > { %v815_v37 = vsel %vm732_vm7, %v2424_v36, 0.0 }
 0x587   : > { %v1312_v39 = vpop.xlane.xlu0 %1311  ;;  %816 = vadd.xlane.f32.xlu1 %v815_v37  ;;  %v1522_v37 = vld [vmem:[%s2718_s29 + $0x18] sm:$0xff] }
 0x588   : > { %v1313_v40 = vsub.f32 %v1309_v22, %v1312_v39  ;;  %v1421_v22 = vrot.slane %v2786_v46, %v1420_v21 }
 0x589   : > { %v2426_v41 = vpop.eup %2425 }
 0x58a   : > { %v1314_v42 = vmul.f32 1.442695, %v1313_v40  ;;  %v982_v43 = vsel %vm732_vm7, %v2426_v41, 0.0  ;;  %v1601_v40 = vld [vmem:[%s2723_s28] sm:$0xff] }
 0x58b   : > { %983 = vadd.xlane.f32.xlu0 %v982_v43 }
 0x58c   : > { %2429 = vpow2.f32 %v1314_v42  ;;  %v1603_v42 = vld [vmem:[%s2723_s28 + $0x10] sm:$0xff] }
 0x58e   : > { %v2428_v45 = vpop.eup %2427 }
 0x58f   : > { %v1149_v47 = vsel %vm732_vm7, %v2428_v45, 0.0 }
 0x590   : > { %1150 = vadd.xlane.f32.xlu1 %v1149_v47 }
 0x596   : > { %v2430_v48 = vpop.eup %2429 }
 0x597   : > { %v1316_v49 = vsel %vm732_vm7, %v2430_v48, 0.0 }
 0x598   : > { %1317 = vadd.xlane.f32.xlu0 %v1316_v49  ;;  %v1606_v49 = vld [vmem:[%s2723_s28 + $0x28] sm:$0xff] }
 0x5a1   : > { %1154 = vrot.lane.b32.xlu1 %v2796_v57, %s2554_s27 }
 0x5a5   : > { %1321 = vrot.lane.b32.xlu1 %v2796_v57, %s2555_s26 }
 0x5ae   : > { %987 = vrot.lane.b32.xlu0 %v2796_v57, %s2556_s13 }
 0x614   : > { %v817_v50 = vpop.xlane.xlu1 %816 }
 0x615   : > { %2431 = vrcp.f32 %v817_v50 }
 0x618   : > { %v984_v51 = vpop.xlane.xlu0 %983 }
 0x619   : > { %2433 = vrcp.f32 %v984_v51 }
 0x61d   : > { %v1151_v52 = vpop.xlane.xlu1 %1150 }
 0x61e   : > { %2435 = vrcp.f32 %v1151_v52 }
 0x61f   : > { %v2432_v53 = vpop.eup %2431 }
 0x620   : > { %v819_v54 = vmul.f32 %v2432_v53, %v2424_v36  ;;  %v2292_v36 = vpack.c.bf16 %v1520_v34, %v1519_v33 }
 0x621   : > { %v1155_v59 = vpop.permute.xlu1 %1154 }
 0x622   : > { %2175 = vmatmul.mubr.msk.f32.vlgmr.msra.gmra.mrb[4].mxu1 %vm732_vm7, %v819_v54  ;;  %v1511_v54 = vsub.s32 6, %v2782_v44 }
 0x623   : > { %2184 = vmatprep.mubr.msk.f32.mxu1 %vm2544_vm5, %v2545_v38  ;;  %v2434_v56 = vpop.eup %2433 }
 0x624   : > { %v986_v58 = vmul.f32 %v2434_v56, %v2426_v41  ;;  %v1602_v41 = vld [vmem:[%s2723_s28 + $0x8] sm:$0xff]  ;;  %v1512_v56 = vrot.slane %v2786_v46, %v1511_v54 }
 0x625   : > { %v1318_v55 = vpop.xlane.xlu0 %1317  ;;  %v1322_v62 = vpop.permute.xlu1 %1321  ;;  %v2298_v43 = vpack.c.bf16 %v1602_v41, %v1601_v40 }
 0x626   : > { %2437 = vrcp.f32 %v1318_v55  ;;  %v1516_v55 = vsub.s32 7, %v2782_v44 }
 0x628   : > { %v2436_v57 = vpop.eup %2435 }
 0x629   : > { %v988_v60 = vpop.permute.xlu0 %987  ;;  %v1153_v61 = vmul.f32 %v2436_v57, %v2428_v45  ;;  %v1604_v45 = vld [vmem:[%s2723_s28 + $0x18] sm:$0xff] }
 0x62a   : > { %2183 = vmatpush3.msra.mxu1 %v988_v60  ;;  %v2301_v47 = vpack.c.bf16 %v1604_v45, %v1603_v42  ;;  %v1517_v60 = vrot.slane %v2786_v46, %v1516_v55 }
 0x62b   : > { %2185 = vmatmul.mubr.msk.f32.vlgmr.msra.gmra.mrb[6].mxu1 %vm732_vm7, %v986_v58  ;;  %2192 = vmatprep.subr.mxu1 %v2545_v38 }
 0x62c   : > { %2193 = vmatpush3.msra.mxu1 %v1155_v59  ;;  %2194 = vmatprep.mubr.msk.f32.mxu1 %vm2544_vm5, %v2545_v38 }
 0x62d   : > { %2202 = vmatprep.subr.mxu1 %v2545_v38 }
 0x62f   : > { %2195 = vmatmul.mubr.msk.f32.vlgmr.msra.gmra.mrb[8].mxu1 %vm732_vm7, %v1153_v61 }
 0x630   : > { %v2438_v63 = vpop.eup %2437  ;;  %2203 = vmatpush3.msra.mxu1 %v1322_v62  ;;  %2204 = vmatprep.mubr.msk.f32.mxu1 %vm2544_vm5, %v2545_v38  ;;  %v1607_v62 = vld [vmem:[%s2723_s28 + $0x30] sm:$0xff] }
 0x631   : > { %v1320_v0 = vmul.f32 %v2438_v63, %v2430_v48  ;;  %2291 = vmatprep.subr.bf16.mxu1 %v2543_v35  ;;  %v1605_v48 = vld [vmem:[%s2723_s28 + $0x20] sm:$0xff] }
 0x632   : > { %v2304_v50 = vpack.c.bf16 %v1606_v49, %v1605_v48 }
 0x633   : > { %2205 = vmatmul.mubr.msk.f32.vlgmr.msra.gmra.mrb[10].mxu1 %vm732_vm7, %v1320_v0  ;;  %v1525_v0 = vsub.s32 2, %v2782_v44  ;;  %v1718_v44 = vld [vmem:[%s3017_s8 + $0x8] sm:$0xff] (!%p2058_p1) }
 0x634   : > { %2226 = vmatprep.mubr.msk.f32.mxu1 %vm2544_vm5, %v2545_v38  ;;  %2293 = vmatpush3.bf16.msra.mxu1 %v2292_v36  ;;  %v2059_v36 = vld [vmem:[%s3016_s7] ss:$0 sm:$0xff] (!%p2058_p1) }
 0x635   : > { %2294 = vmatprep.subr.bf16.mxu1 %v2543_v35  ;;  %v1526_v1 = vrot.slane %v2786_v46, %v1525_v0 }
 0x6f5   : > { %v892_v4 = vpop.f32.mrb[4].mxu1 }
 0x6f6   : > { %v2176_v5 = vpop.f32.mrb[5].mxu1 }
 0x6fe   : > { %v1059_v9 = vpop.f32.mrb[6].mxu1 }
 0x6ff   : > { %1398 = vrot.lane.b32.xlu0 %v1059_v9, %s2557_s22  ;;  %v2186_v10 = vpop.f32.mrb[7].mxu1 }
 0x702   : > { %v1226_v11 = vpop.f32.mrb[8].mxu1 }
 0x703   : > { %1402 = vrot.lane.b32.xlu1 %v1226_v11, %s2558_s14  ;;  %v2196_v12 = vpop.f32.mrb[9].mxu1 }
 0x706   : > { %v1393_v13 = vpop.f32.mrb[10].mxu1 }
 0x707   : > { %1406 = vrot.lane.b32.xlu0 %v1393_v13, %s2559_s17  ;;  %v2206_v14 = vpop.f32.mrb[11].mxu1  ;;  %v1717_v13 = vld [vmem:[%s3017_s8] sm:$0xff] (!%p2058_p1) }
 0x708   : > { %v2560_v14 = vmov (!%p2058_p1), 0.0|0.0  }
 0x771   : > { %v1399_v15 = vpop.permute.xlu0 %1398 }
 0x772   : > { %v1409_v17 = vsel %vm732_vm7, %v892_v4, %v1399_v15  ;;  %v2310_v15 = vpack.c.bf16 (!%p2058_p1), %v1718_v44, %v1717_v13 }
 0x775   : > { %v1403_v16 = vpop.permute.xlu1 %1402 }
 0x776   : > { %v1411_v18 = vsel %vm1410_vm9, %v1409_v17, %v1403_v16  ;;  %v1719_v16 = vld [vmem:[%s3017_s8 + $0x10] sm:$0xff] (!%p2058_p1)  ;;  %v1720_v17 = vld [vmem:[%s3017_s8 + $0x18] sm:$0xff] (!%p2058_p1) }
 0x779   : > { %v1407_v19 = vpop.permute.xlu0 %1406 }
 0x77a   : > { %v1413_v20 = vsel %vm1412_vm10, %v1411_v18, %v1407_v19  ;;  %v2314_v18 = vpack.c.bf16 (!%p2058_p1), %v1720_v17, %v1719_v16 }
 0x77b   : > { %2216 = vmatmul.mubr.msk.f32.vlgmr.msra.gmra.mrb[6].mxu0 %vm614_vm4, %v1413_v20 }
 0x77c   : > { %2245 = vmatprep.mubr.msk.f32.mxu0 %vm2544_vm5, %v2545_v38  ;;  %2299 = vmatpush3.bf16.msra.mxu0 %v2298_v43 }
 0x77d   : > { %2300 = vmatprep.subr.bf16.mxu0 %v2543_v35 }
 0x780   : > { %2302 = vmatpush3.bf16.msra.mxu0 %v2301_v47 }
 0x781   : > { %2303 = vmatprep.subr.bf16.mxu0 %v2543_v35 }
 0x784   : > { %2305 = vmatpush3.bf16.msra.mxu0 %v2304_v50 }
 0x785   : > { %2306 = vmatprep.subr.bf16.mxu0 %v2543_v35  ;;  %v1608_v35 = vld [vmem:[%s2723_s28 + $0x38] sm:$0xff] }
 0x786   : > { %v2307_v63 = vpack.c.bf16 %v1608_v35, %v1607_v62 }
 0x788   : > { %2308 = vmatpush3.bf16.msra.mxu0 %v2307_v63 }
 0x789   : > { %2309 = vmatprep.subr.bf16.mxu0 (!%p2058_p1), %v2560_v14 }
 0x84e   : > { %v1491_v23 = vpop.f32.mrb[6].mxu0 }
 0x84f   : > { %v1492_v24 = vadd.f32 %v1491_v23, %v1421_v22  ;;  %v2217_v26 = vpop.f32.mrb[7].mxu0 }
 0x850   : > { %v1722_v26 = vld [vmem:[%s3017_s8 + $0x28] sm:$0xff] (!%p2058_p1) }
 0x851   : > { %v1495_v27 = vadd.f32 %v1492_v24, %v2764_v25  ;;  %v1521_v25 = vld [vmem:[%s2718_s29 + $0x10] sm:$0xff]  ;;  %v1721_v24 = vld [vmem:[%s3017_s8 + $0x20] sm:$0xff] (!%p2058_p1)  ;;  %s3059_s29 = sld [smem:[#allocation21_spill]] (!%p2058_p1) }
 0x852   : > { %v2295_v39 = vpack.c.bf16 %v1522_v37, %v1521_v25  ;;  %v2060_v37 = vld [vmem:[%s3016_s7 + $0x1] ss:$0 sm:$0xff] (!%p2058_p1) }
 0x853   : > { %v1496_v28 = vsel %vm614_vm4, %v1495_v27, 0.0 }
 0x854   : > { %1497 = vadd.xlane.f32.xlu1 %v1496_v28  ;;  %2296 = vmatpush3.bf16.msra.mxu1 %v2295_v39  ;;  %v2562_v28 = vmov (!%p2058_p1), 0.0  }
 0x857   : > { %v2061_v41 = vld [vmem:[%s3059_s29] ss:$0 sm:$0xff] (!%p2058_p1) }
 0x8e1   : > { %v1498_v29 = vpop.xlane.xlu1 %1497 }
 0x8e2   : > { %v1499_v30 = vmul.f32 0.03125, %v1498_v29  ;;  %v1723_v29 = vld [vmem:[%s3017_s8 + $0x30] sm:$0xff] (!%p2058_p1) }
 0x8e4   : > { %v1500_v38 = vsub.f32 %v1495_v27, %v1499_v30  ;;  %v1724_v30 = vld [vmem:[%s3017_s8 + $0x38] sm:$0xff] (!%p2058_p1) }
 0x8e6   : > { %v1501_v31 = vmul.f32 %v1500_v38, %v1500_v38 }
 0x8e8   : > { %v1502_v32 = vsel %vm614_vm4, %v1501_v31, 0.0 }
 0x8e9   : > { %1503 = vadd.xlane.f32.xlu0 %v1502_v32 }
 0x976   : > { %v1504_v51 = vpop.xlane.xlu0 %1503 }
 0x977   : > { %v1505_v52 = vmul.f32 0.03125, %v1504_v51 }
 0x979   : > { %v1506_v53 = vadd.f32 1e-06, %v1505_v52 }
 0x97b   : > { %2439 = vrsqrt.f32 %v1506_v53 }
 0x985   : > { %v2440_v58 = vpop.eup %2439 }
 0x986   : > { %v1508_v59 = vmul.f32 %v2440_v58, %v1500_v38  ;;  %v2322_v38 = vpack.c.bf16 (!%p2058_p1), %v1724_v30, %v1723_v29 }
 0x988   : > { %v1513_v57 = vmul.f32 %v1512_v56, %v1508_v59 }
 0x98a   : > { %v1518_v61 = vadd.f32 %v1517_v60, %v1513_v57 }
 0x98c   : > { %2227 = vmatmul.mubr.msk.f32.vlgmr.msra.gmra.mrb[12].mxu1 %vm614_vm4, %v1518_v61 }
 0xa5f   : > { %v1596_v2 = vpop.f32.mrb[12].mxu1 }
 0xa60   : > { %v1597_v3 = vadd.f32 %v1596_v2, %v1526_v1  ;;  %v2228_v4 = vpop.f32.mrb[13].mxu1 }
 0xa62   : > { %v1600_v5 = vmax.f32 %v1597_v3, 0.0 }
 0xa64   : > { %2246 = vmatmul.mubr.msk.f32.vlgmr.msra.gmra.mrb[8].mxu0 %vm724_vm6, %v1600_v5 }
 0xa65   : > { %2312 = vmatpush3.bf16.xpose.msk.msra.mxu0 (!%p2058_p1), %vm2910_vm11, %v2310_v15  ;;  %2264 = vmatprep.mubr.msk.f32.mxu0 (!%p2058_p1), %vm2561_vm12, %v2562_v28 }
 0xa66   : > { %2313 = vmatprep.subr.bf16.mxu0 (!%p2058_p1), %v2560_v14 }
 0xa6d   : > { %2316 = vmatpush3.bf16.xpose.msk.msra.mxu0 (!%p2058_p1), %vm2910_vm11, %v2314_v18 }
 0xa6e   : > { %2317 = vmatprep.subr.bf16.mxu0 (!%p2058_p1), %v2560_v14 }
 0xb36   : > { %1691 = sbr.rel (%p2058_p1) target bundleno = 3404 (0xd4c), region = 68 }
 0xb37   : > { %v1682_v8 = vpop.f32.mrb[8].mxu0 }
 0xb38   : > { %v1683_v9 = vadd.f32 %v1682_v8, %v1612_v7  ;;  %v2247_v10 = vpop.f32.mrb[9].mxu0 }
 0xb3a   : > { %v1686_v11 = vadd.f32 %v1683_v9, %v1495_v27  ;;  %v2318_v27 = vpack.c.bf16 (!%p2058_p1), %v1722_v26, %v1721_v24 }
 0xb3c   : > { %1687 = vst.msk [vmem:[#allocation2] sm:$0xff] %vm614_vm4, %v1686_v11  ;;  %v1694_v12 = vsel (!%p2058_p1), %vm614_vm4, %v1686_v11, 0.0  ;;  %2320 = vmatpush3.bf16.xpose.msk.msra.mxu0 (!%p2058_p1), %vm2910_vm11, %v2318_v27 }
 0xb3d   : > { %1695 = vadd.xlane.f32.xlu0 %v1694_v12  ;;  %2321 = vmatprep.subr.bf16.mxu0 %v2560_v14 }
 0xb44   : > { %2324 = vmatpush3.bf16.xpose.msk.msra.mxu0 %vm2910_vm11, %v2322_v38 }
 0xbca   : > { %v1696_v19 = vpop.xlane.xlu0 %1695 }
 0xbcb   : > { %v1697_v20 = vmul.f32 0.03125, %v1696_v19 }
 0xbcd   : > { %v1698_v21 = vsub.f32 %v1686_v11, %v1697_v20 }
 0xbcf   : > { %v1699_v22 = vmul.f32 %v1698_v21, %v1698_v21 }
 0xbd1   : > { %v1700_v23 = vsel %vm614_vm4, %v1699_v22, 0.0 }
 0xbd2   : > { %1701 = vadd.xlane.f32.xlu0 %v1700_v23 }
 0xc5f   : > { %v1702_v31 = vpop.xlane.xlu0 %1701 }
 0xc60   : > { %v1703_v32 = vmul.f32 0.03125, %v1702_v31 }
 0xc62   : > { %v1704_v33 = vadd.f32 1e-06, %v1703_v32 }
 0xc64   : > { %2441 = vrsqrt.f32 %v1704_v33 }
 0xc6e   : > { %v2442_v34 = vpop.eup %2441 }
 0xc6f   : > { %v1706_v25 = vmul.f32 %v2442_v34, %v1698_v21 }
 0xc71   : > { %v1711_v39 = vmul.f32 %v2059_v36, %v1706_v25 }
 0xc73   : > { %v1716_v40 = vadd.f32 %v2060_v37, %v1711_v39 }
 0xc75   : > { %2265 = vmatmul.mubr.msk.f32.vlgmr.msra.gmra.mrb[0].mxu0 %vm614_vm4, %v1716_v40 }
 0xd48   : > { %v1825_v42 = vpop.f32.mrb[0].mxu0 }
 0xd49   : > { %v1826_v43 = vadd.f32 %v2061_v41, %v1825_v42  ;;  %v2266_v45 = vpop.f32.mrb[1].mxu0 }
 0xd4b   : > { %1829 = vst.msk [vmem:[%s465_s23] sm:$0xff] %vm724_vm6, %v1826_v43 }
 0xd4c PF: > { %s3060_s15 = sld [smem:[#allocation9_spill]]  ;;  %s3063_s24 = sld [smem:[#allocation22_spill]] }
 0xd4d   : > { %s3061_s28 = sld [smem:[#allocation7_spill]]  ;;  %s1852_s12 = sshll.u32 %s465_s23, 4  ;;  %s1853_s12 = int_to_ptr.vmem [resolvable:$true] %s1852_s12 }
 0xd4e   : > { %s2443_s9 = scalar_lea.vmem %s1853_s12, 128  ;;  %s2563_s25 = smov [#allocation3]  }
 0xd4f   : > { %p2444_p2 = scmp.ne.s32.totalorder %s1853_s12, %s2443_s9  ;;  %s2447_s10 = sshll.u32 %s2563_s25, 4  ;;  %s2448_s10 = int_to_ptr.vmem [resolvable:$false] %s2447_s10 }
 0xd50   : > { %s2449_s27 = scalar_lea.vmem %s2448_s10, 256  ;;  %p2450_p6 = scmp.lt.s32.totalorder %s1853_s12, %s2448_s10 }
 0xd51   : > { %p2445_p4 = pnand %p2444_p2, %p2673_p3  ;;  %p2451_p7 = scmp.lt.s32.totalorder %s2449_s27, %s2443_s9 }
 0xd52   : > { %s2072_s20 = sshll.u32 %s3060_s15, 7  ;;  %s3064_s0 = smov %s3063_s24 }
 0xd53   : > { %s2958_s19 = scalar_lea.hbm %s3063_s24, %s2072_s20  ;;  %s3065_s2 = sand.u32 1, %s3061_s28  }
 0xd54   : > { %s1831_s3 = scalar_lea.sflag [#allocation4], %s3065_s2  ;;  %p2446_p5 = pneg %p2445_p4 }
 0xd55   : > { %p2452_p8 = por %p2451_p7, %p2450_p6 }
 0xd57   : > { %p2453_p10 = pnand %p2452_p8, %p2446_p5 }
 0xd59   : > { %2456 = shalt.err (!%p2453_p10)
}
 0xd5a   : > { %s2457_s16 = scalar_lea.hbm %s2958_s19, 128  ;;  %s2461_s13 = scalar_lea.hbm %s3064_s0, 256 }
 0xd5b   : > { %p2458_p11 = scmp.ne.s32.totalorder %s2958_s19, %s2457_s16  ;;  %p2462_p0 = scmp.lt.u32.totalorder %s2958_s19, %s3064_s0 }
 0xd5c   : > { %p2463_p1 = scmp.lt.u32.totalorder %s2461_s13, %s2457_s16  ;;  %p2465_p4 = scmp.lt.u32.totalorder %s2457_s16, %s2958_s19 }
 0xd5d   : > { %p2459_p12 = pnand %p2458_p11, %p2673_p3 }
 0xd5e   : > { %p2464_p2 = por %p2463_p1, %p2462_p0 }
 0xd5f   : > { %p2460_p13 = pneg %p2459_p12 }
 0xd60   : > { %p2466_p5 = por %p2465_p4, %p2464_p2 }
 0xd62   : > { %p2467_p6 = pnand %p2466_p5, %p2460_p13 }
 0xd64   : > { %2470 = shalt.err (!%p2467_p6)
}
 0xd65   : > { %2325 = dma.vmem_to_hbm [thread:$0]  (%p2673_p3), %s1853_s12, 128, %s2958_s19, %s1831_s3  }
 0xd66 PF: > { %s3066_s17 = sld [smem:[#allocation12_spill]]  ;;  %s3067_s29 = sld [smem:[#allocation6_spill]] }
 0xd6c   : > { %p2331_p7 = scmp.ge.s32.totalorder %s3066_s17, 2  ;;  %s1867_s28 = sand.u32 1, %s3067_s29  }
 0xd6d   : > { %s1868_s20 = scalar_lea.sflag [#allocation4], %s1867_s28 }
 0xd6e   : > { %p2328_p8 = pnand %p2331_p7, %p2683_p9 }
 0xd70   : > { %2504 = dma.done.wait (!%p2328_p8), %s1868_s20, 128  }
 0xd71   : > { %2506 = vsyncadd (!%p2328_p8), %s1868_s20, 4294967168  ;;  %s25_s24 = sadd.s32 1, %s3066_s17   ;;  %s3069_s17 = sld [smem:[#allocation7_spill]] }
 0xd72   : > { %p22_p10 = scmp.ge.s32.totalorder %s25_s24, 6   ;;  %s3070_s18 = sld [smem:[#allocation8_spill]] }
 0xd73   : > { %s3071_s19 = sld [smem:[#allocation17_spill]]  ;;  %s3072_s20 = sld [smem:[#allocation10_spill]] }
 0xd74   : > { %s3073_s21 = sld [smem:[#allocation11_spill]]  ;;  %s3074_s22 = sld [smem:[#allocation13_spill]] }
 0xd75   : > { %s3075_s23 = sld [smem:[#allocation15_spill]]  ;;  %24 = sbr.rel (!%p22_p10) target bundleno = 11 (0xb), region = 130 }
 0xd7c   :  { %1884 = vsyncpa [#allocation4], 1 }
 0xd7d   :  { %1886 = vsyncpa [#allocation4 + $0x1], 1 }

</bundles_post_ra>
